<compile_context>
chip_gen: v5e
topology: v5e:2x2
jax: 0.10.0
libtpu: 0.0.40
codegen_flags: <defaults>
</compile_context>

<pallas_src>
import math

import jax
import jax.numpy as jnp
from jax.experimental import pallas as pl
from jax.experimental.pallas import tpu as pltpu

# ---------------- synthetic small "LlamaConfig" ----------------
VOCAB = 128
HIDDEN = 32
N_HEADS = 4
HEAD_DIM = HIDDEN // N_HEADS
INTER = 64
N_LAYERS = 2          # layers in this pipeline stage (start_layer_idx..end_layer_idx)
EPS = 1e-6            # rms_norm_eps (final LayerNorm uses the same eps)
PAD_TOKEN_ID = 0
ROPE_BASE = 10000.0
NEG_INF = -1e30


# ---------------- fused stage kernel: all layers + final norm + lm_head ----------------
def _stage_kernel(x_ref, wqkv_ref, wo_ref, wgu_ref, wd_ref,
                  ln1_ref, ln2_ref, cos_ref, sin_ref, bias_ref,
                  fln_w_ref, fln_b_ref, wlm_ref,
                  logits_ref, h_scr):
    """One grid step == one LlamaDecoderLayer; last step also runs norm + lm_head.

    The (T, D) f32 hidden state is carried across layers in VMEM scratch; stacked
    bf16 weights are BlockSpec-sliced per layer (Squeezed leading dim) so layer
    l+1 weights prefetch while layer l computes.
    """
    layer = pl.program_id(0)
    last = pl.num_programs(0) - 1

    @pl.when(layer == 0)
    def _():
        h_scr[...] = x_ref[...]

    x = h_scr[...]                                    # (T, D) f32 carry
    T, D = x.shape

    def rmsnorm(h, w):                                # w: (1, D) f32
        var = jnp.mean(h * h, axis=-1, keepdims=True)
        return h * jax.lax.rsqrt(var + EPS) * w

    # ---- self attention ----
    residual = x
    h = rmsnorm(x, ln1_ref[...])
    # Fused projection -> [q | k | v | q@R | k@R]; rotate-half folded into weights.
    proj = jnp.dot(h.astype(jnp.bfloat16), wqkv_ref[...],
                   preferred_element_type=jnp.float32)            # (T, 5D) f32
    cos = cos_ref[...]                                            # (T, D) f32
    sin = sin_ref[...]
    q = proj[:, 0 * D:1 * D] * cos + proj[:, 3 * D:4 * D] * sin   # RoPE
    k = proj[:, 1 * D:2 * D] * cos + proj[:, 4 * D:5 * D] * sin
    v = proj[:, 2 * D:3 * D]

    # Fold heads onto the sublane (row) axis: row index = head*T + token.
    def fold_heads(t):                                # (T, D) -> (H*T, Dh)
        return jnp.concatenate(
            [t[:, hd * HEAD_DIM:(hd + 1) * HEAD_DIM] for hd in range(N_HEADS)],
            axis=0)

    qf = fold_heads(q).astype(jnp.bfloat16)           # (H*T, Dh)
    kf = fold_heads(k).astype(jnp.bfloat16)
    vf = fold_heads(v).astype(jnp.bfloat16)

    scale = 1.0 / math.sqrt(HEAD_DIM)
    # Single lane-dense (H*T, H*T) score matrix; cross-head / cross-sequence /
    # non-causal entries are killed by the precomputed additive bias.
    scores = jnp.einsum('td,sd->ts', qf, kf,
                        preferred_element_type=jnp.float32) * scale
    scores = scores + bias_ref[...]
    scores = scores - jnp.max(scores, axis=-1, keepdims=True)
    p = jnp.exp(scores)
    p = p * pl.reciprocal(jnp.sum(p, axis=-1, keepdims=True), approx=True)

    ctx = jnp.dot(p.astype(jnp.bfloat16), vf,
                  preferred_element_type=jnp.float32)             # (H*T, Dh) f32
    attn = jnp.concatenate(
        [ctx[hd * T:(hd + 1) * T, :] for hd in range(N_HEADS)], axis=1)   # (T, D)
    attn = jnp.dot(attn.astype(jnp.bfloat16), wo_ref[...],
                   preferred_element_type=jnp.float32)
    h = residual + attn

    # ---- SwiGLU MLP (gate & up fused: lane-dense N = 2*INTER = 128) ----
    residual = h
    g = rmsnorm(h, ln2_ref[...]).astype(jnp.bfloat16)
    gu = jnp.dot(g, wgu_ref[...], preferred_element_type=jnp.float32)     # (T, 2*INTER)
    gate = gu[:, :INTER]
    up = gu[:, INTER:]
    act = gate * pl.reciprocal(1.0 + jnp.exp(-gate))   # exact sigmoid for parity
    mlp = jnp.dot((act * up).astype(jnp.bfloat16), wd_ref[...],
                  preferred_element_type=jnp.float32)
    new_h = residual + mlp

    h_scr[...] = new_h                                 # carry to next layer (VMEM only)

    # ---- final LayerNorm + lm_head, fused into the last grid step ----
    @pl.when(layer == last)
    def _():
        mean = jnp.mean(new_h, axis=-1, keepdims=True)
        var = jnp.mean((new_h - mean) ** 2, axis=-1, keepdims=True)  # biased var (torch LayerNorm)
        hn = (new_h - mean) * jax.lax.rsqrt(var + EPS) * fln_w_ref[...] + fln_b_ref[...]
        logits_ref[...] = jnp.dot(hn.astype(jnp.bfloat16), wlm_ref[...],
                                  preferred_element_type=jnp.float32)   # (T, VOCAB) lane-dense


def llama_stage_pallas(x, wqkv, wo, wgu, wd, ln1, ln2, cos, sin, bias,
                       fln_w, fln_b, w_lm):
    T, D = x.shape
    L = wqkv.shape[0]
    V = w_lm.shape[1]
    grid_spec = pltpu.PrefetchScalarGridSpec(
        num_scalar_prefetch=0,
        grid=(L,),
        in_specs=[
            pl.BlockSpec((T, D), lambda l: (0, 0)),                         # hidden (layer 0 only)
            pl.BlockSpec((pl.Squeezed(), D, 5 * D), lambda l: (l, 0, 0)),   # fused q,k,v,qR,kR
            pl.BlockSpec((pl.Squeezed(), D, D), lambda l: (l, 0, 0)),       # o_proj
            pl.BlockSpec((pl.Squeezed(), D, 2 * INTER), lambda l: (l, 0, 0)),  # fused gate+up
            pl.BlockSpec((pl.Squeezed(), INTER, D), lambda l: (l, 0, 0)),   # down_proj
            pl.BlockSpec((pl.Squeezed(), 1, D), lambda l: (l, 0, 0)),       # input_layernorm
            pl.BlockSpec((pl.Squeezed(), 1, D), lambda l: (l, 0, 0)),       # post_attn_layernorm
            pl.BlockSpec((T, D), lambda l: (0, 0)),                         # cos
            pl.BlockSpec((T, D), lambda l: (0, 0)),                         # sin
            pl.BlockSpec((N_HEADS * T, N_HEADS * T), lambda l: (0, 0)),     # additive attn bias
            pl.BlockSpec((1, D), lambda l: (0, 0)),                         # final LN weight
            pl.BlockSpec((1, D), lambda l: (0, 0)),                         # final LN bias
            pl.BlockSpec((D, V), lambda l: (0, 0)),                         # lm_head
        ],
        out_specs=pl.BlockSpec((T, V), lambda l: (0, 0)),
        scratch_shapes=[pltpu.VMEM((T, D), jnp.float32)],
    )
    return pl.pallas_call(
        _stage_kernel,
        out_shape=jax.ShapeDtypeStruct((T, V), jnp.float32),
        grid_spec=grid_spec,
        compiler_params=pltpu.CompilerParams(
            dimension_semantics=("arbitrary",)),   # layer axis is a sequential carry
    )(x, wqkv, wo, wgu, wd, ln1, ln2, cos, sin, bias, fln_w, fln_b, w_lm)


# ---------------- parameters, RoPE tables, masks, forward ----------------
def rotate_half_matrix():
    """R such that t @ R == rotate_half(t) per head (signs folded into R)."""
    half = HEAD_DIM // 2
    r = jnp.zeros((HEAD_DIM, HEAD_DIM), jnp.float32)
    r = r.at[jnp.arange(half) + half, jnp.arange(half)].set(-1.0)
    r = r.at[jnp.arange(half), jnp.arange(half) + half].set(1.0)
    return jnp.kron(jnp.eye(N_HEADS, dtype=jnp.float32), r)     # (D, D) block-diagonal


def init_params(key):
    def nrm(k, shape):
        return jax.random.normal(k, shape, dtype=jnp.float32) * 0.02

    keys = iter(jax.random.split(key, 2 + 7 * N_LAYERS))
    emb = nrm(next(keys), (VOCAB, HIDDEN))
    emb = emb.at[PAD_TOKEN_ID].set(0.0)              # nn.Embedding padding_idx row

    rot = rotate_half_matrix()

    wqkv, wo, wgu, wd, ln1, ln2 = [], [], [], [], [], []
    for _ in range(N_LAYERS):
        wq = nrm(next(keys), (HIDDEN, HIDDEN))
        wk = nrm(next(keys), (HIDDEN, HIDDEN))
        wv = nrm(next(keys), (HIDDEN, HIDDEN))
        # Fold rotate-half into extra projection columns: rotate_half(h@Wq) == h@(Wq@R).
        wqkv.append(jnp.concatenate([wq, wk, wv, wq @ rot, wk @ rot], axis=1))  # (D, 5D)
        wo.append(nrm(next(keys), (HIDDEN, HIDDEN)))
        wg = nrm(next(keys), (HIDDEN, INTER))
        wu = nrm(next(keys), (HIDDEN, INTER))
        wgu.append(jnp.concatenate([wg, wu], axis=1))        # (D, 2*INTER)
        wd.append(nrm(next(keys), (INTER, HIDDEN)))
        ln1.append(jnp.ones((1, HIDDEN), jnp.float32))
        ln2.append(jnp.ones((1, HIDDEN), jnp.float32))

    return dict(
        embed=emb,
        wqkv=jnp.stack(wqkv).astype(jnp.bfloat16),   # (L, D, 5D)   bf16 MXU operands
        wo=jnp.stack(wo).astype(jnp.bfloat16),       # (L, D, D)
        wgu=jnp.stack(wgu).astype(jnp.bfloat16),     # (L, D, 2*INTER)
        wd=jnp.stack(wd).astype(jnp.bfloat16),       # (L, INTER, D)
        ln1=jnp.stack(ln1),                          # (L, 1, D) f32
        ln2=jnp.stack(ln2),                          # (L, 1, D) f32
        final_ln_w=jnp.ones((1, HIDDEN), jnp.float32),
        final_ln_b=jnp.zeros((1, HIDDEN), jnp.float32),
        lm_head=nrm(next(keys), (HIDDEN, VOCAB)).astype(jnp.bfloat16),
    )


def rope_tables(seq_len):
    inv_freq = 1.0 / (ROPE_BASE ** (jnp.arange(0, HEAD_DIM, 2, dtype=jnp.float32) / HEAD_DIM))
    pos = jnp.arange(seq_len, dtype=jnp.float32)     # position_ids = arange(S) (attention_mask=None)
    freqs = jnp.outer(pos, inv_freq)                 # (S, HEAD_DIM/2)
    emb = jnp.concatenate([freqs, freqs], axis=-1)   # (S, HEAD_DIM)
    cos_h, sin_h = jnp.cos(emb), jnp.sin(emb)
    # Tiled to full hidden width so RoPE applies on the (T, D) projection view.
    return jnp.tile(cos_h, (1, N_HEADS)), jnp.tile(sin_h, (1, N_HEADS))   # (S, D)


def attention_bias(batch, seq_len):
    """Layer-invariant additive bias over head-folded rows (index = head*T + token)."""
    T = batch * seq_len
    tok = jnp.arange(T, dtype=jnp.int32)
    head = jnp.arange(N_HEADS, dtype=jnp.int32)
    r_h = jnp.repeat(head, T)                       # (H*T,)
    r_t = jnp.tile(tok, (N_HEADS,))                 # (H*T,)
    same_head = r_h[:, None] == r_h[None, :]
    same_seq = (r_t[:, None] // seq_len) == (r_t[None, :] // seq_len)
    causal = r_t[None, :] <= r_t[:, None]
    ok = same_head & same_seq & causal
    return jnp.where(ok, 0.0, NEG_INF).astype(jnp.float32)      # (H*T, H*T)


def llama_stage_forward(params, input_ids):
    B, S = input_ids.shape
    # is_first: embedding lookup (gather) kept as plain-JAX glue.
    hidden = params["embed"][input_ids].reshape(B * S, HIDDEN)   # (T, D) f32, token t = b*S + s
    cos, sin = rope_tables(S)
    cos = jnp.tile(cos, (B, 1))                                  # (T, D)
    sin = jnp.tile(sin, (B, 1))
    bias = attention_bias(B, S)                                  # (H*T, H*T)
    # Decoder layers + final LayerNorm + lm_head all inside one pallas_call.
    logits = llama_stage_pallas(hidden, params["wqkv"], params["wo"], params["wgu"],
                                params["wd"], params["ln1"], params["ln2"],
                                cos, sin, bias,
                                params["final_ln_w"], params["final_ln_b"],
                                params["lm_head"])
    return logits.reshape(B, S, VOCAB)


if __name__ == "__main__":
    key = jax.random.PRNGKey(0)
    pkey, ikey = jax.random.split(key)
    params = init_params(pkey)

    B, S = 2, 8
    input_ids = jax.random.randint(ikey, (B, S), 0, VOCAB, dtype=jnp.int32)

    logits = llama_stage_forward(params, input_ids)
    logits = jax.block_until_ready(logits)

    assert logits.shape == (B, S, VOCAB), logits.shape
    assert bool(jnp.all(jnp.isfinite(logits)))
    print("KERNEL_OK")
</pallas_src>

<mosaic_0001>
module attributes {stable_mosaic.version = 11 : i64} {
  func.func @_stage_kernel(%arg0: i32, %arg1: memref<16x32xf32, #tpu.memory_space<vmem>>, %arg2: memref<1x32x160xbf16, #tpu.memory_space<vmem>>, %arg3: memref<1x32x32xbf16, #tpu.memory_space<vmem>>, %arg4: memref<1x32x128xbf16, #tpu.memory_space<vmem>>, %arg5: memref<1x64x32xbf16, #tpu.memory_space<vmem>>, %arg6: memref<1x1x32xf32, #tpu.memory_space<vmem>>, %arg7: memref<1x1x32xf32, #tpu.memory_space<vmem>>, %arg8: memref<16x32xf32, #tpu.memory_space<vmem>>, %arg9: memref<16x32xf32, #tpu.memory_space<vmem>>, %arg10: memref<64x64xf32, #tpu.memory_space<vmem>>, %arg11: memref<1x32xf32, #tpu.memory_space<vmem>>, %arg12: memref<1x32xf32, #tpu.memory_space<vmem>>, %arg13: memref<32x128xbf16, #tpu.memory_space<vmem>>, %arg14: memref<16x128xf32, #tpu.memory_space<vmem>>, %arg15: memref<16x32xf32, #tpu.memory_space<vmem>>) attributes {dimension_semantics = [#tpu.dimension_semantics<arbitrary>], iteration_bounds = array<i64: 2>, scalar_prefetch = 0 : i64, scratch_operands = 1 : i64, tpu.core_type = #tpu.core_type<tc>, window_params = [{pipeline_mode = #tpu.pipeline_mode<synchronous>, transform_indices = @transform_0, window_bounds = array<i64: 16, 32>}, {transform_indices = @transform_1, window_bounds = array<i64: 1, 32, 160>}, {transform_indices = @transform_2, window_bounds = array<i64: 1, 32, 32>}, {transform_indices = @transform_3, window_bounds = array<i64: 1, 32, 128>}, {transform_indices = @transform_4, window_bounds = array<i64: 1, 64, 32>}, {transform_indices = @transform_5, window_bounds = array<i64: 1, 1, 32>}, {transform_indices = @transform_6, window_bounds = array<i64: 1, 1, 32>}, {pipeline_mode = #tpu.pipeline_mode<synchronous>, transform_indices = @transform_7, window_bounds = array<i64: 16, 32>}, {pipeline_mode = #tpu.pipeline_mode<synchronous>, transform_indices = @transform_8, window_bounds = array<i64: 16, 32>}, {pipeline_mode = #tpu.pipeline_mode<synchronous>, transform_indices = @transform_9, window_bounds = array<i64: 64, 64>}, {pipeline_mode = #tpu.pipeline_mode<synchronous>, transform_indices = @transform_10, window_bounds = array<i64: 1, 32>}, {pipeline_mode = #tpu.pipeline_mode<synchronous>, transform_indices = @transform_11, window_bounds = array<i64: 1, 32>}, {pipeline_mode = #tpu.pipeline_mode<synchronous>, transform_indices = @transform_12, window_bounds = array<i64: 32, 128>}, {pipeline_mode = #tpu.pipeline_mode<synchronous>, transform_indices = @transform_13, window_bounds = array<i64: 16, 128>}]} {
    %c0_i32 = arith.constant 0 : i32
    %0 = arith.cmpi eq, %arg0, %c0_i32 : i32
    %1 = arith.extui %0 : i1 to i32
    %c0_i32_0 = arith.constant 0 : i32
    %2 = arith.cmpi ne, %1, %c0_i32_0 : i32
    scf.if %2 {
      %c0_45 = arith.constant 0 : index
      %c0_46 = arith.constant 0 : index
      %117 = vector.load %arg1[%c0_45, %c0_46] : memref<16x32xf32, #tpu.memory_space<vmem>>, vector<16x32xf32>
      %c0_47 = arith.constant 0 : index
      %c0_48 = arith.constant 0 : index
      %118 = vector.load %arg15[%c0_47, %c0_48] : memref<16x32xf32, #tpu.memory_space<vmem>>, vector<16x32xf32>
      tpu.vector_store %arg15[%c0_47, %c0_48], %117 {strides = array<i32>} : memref<16x32xf32, #tpu.memory_space<vmem>>, vector<16x32xf32>,
    } else {
    }
    %c0 = arith.constant 0 : index
    %c0_1 = arith.constant 0 : index
    %3 = vector.load %arg15[%c0, %c0_1] : memref<16x32xf32, #tpu.memory_space<vmem>>, vector<16x32xf32>
    %c0_2 = arith.constant 0 : index
    %c0_3 = arith.constant 0 : index
    %c0_4 = arith.constant 0 : index
    %4 = vector.load %arg6[%c0_2, %c0_3, %c0_4] : memref<1x1x32xf32, #tpu.memory_space<vmem>>, vector<1x1x32xf32>
    %5 = vector.shape_cast %4 : vector<1x1x32xf32> to vector<1x32xf32>
    %6 = arith.mulf %3, %3 : vector<16x32xf32>
    %cst = arith.constant dense<0.000000e+00> : vector<16xf32>
    %7 = vector.multi_reduction <add>, %6, %cst [1] : vector<16x32xf32> to vector<16xf32>
    %8 = vector.shape_cast %7 : vector<16xf32> to vector<16x1xf32>
    %cst_5 = arith.constant 3.200000e+01 : f32
    %9 = vector.broadcast %cst_5 : f32 to vector<16x1xf32>
    %10 = arith.divf %8, %9 : vector<16x1xf32>
    %cst_6 = arith.constant 9.99999997E-7 : f32
    %11 = vector.broadcast %cst_6 : f32 to vector<16x1xf32>
    %12 = arith.addf %10, %11 : vector<16x1xf32>
    %13 = math.rsqrt %12 : vector<16x1xf32>
    %14 = vector.broadcast %13 : vector<16x1xf32> to vector<16x32xf32>
    %15 = arith.mulf %3, %14 : vector<16x32xf32>
    %16 = vector.broadcast %5 : vector<1x32xf32> to vector<16x32xf32>
    %17 = arith.mulf %15, %16 : vector<16x32xf32>
    %18 = arith.truncf %17 : vector<16x32xf32> to vector<16x32xbf16>
    %c0_7 = arith.constant 0 : index
    %c0_8 = arith.constant 0 : index
    %c0_9 = arith.constant 0 : index
    %19 = vector.load %arg2[%c0_7, %c0_8, %c0_9] : memref<1x32x160xbf16, #tpu.memory_space<vmem>>, vector<1x32x160xbf16>
    %20 = vector.shape_cast %19 : vector<1x32x160xbf16> to vector<32x160xbf16>
    %cst_10 = arith.constant dense<0.000000e+00> : vector<16x160xf32>
    %21 = tpu.matmul %18, %20, %cst_10 {dimension_numbers = #tpu.dot_dimension_numbers<[1], [0], [0], [1], [0, 0, 1, 1], [], []>} : vector<16x32xbf16>, vector<32x160xbf16>, vector<16x160xf32> -> vector<16x160xf32>
    %c0_11 = arith.constant 0 : index
    %c0_12 = arith.constant 0 : index
    %22 = vector.load %arg8[%c0_11, %c0_12] : memref<16x32xf32, #tpu.memory_space<vmem>>, vector<16x32xf32>
    %c0_13 = arith.constant 0 : index
    %c0_14 = arith.constant 0 : index
    %23 = vector.load %arg9[%c0_13, %c0_14] : memref<16x32xf32, #tpu.memory_space<vmem>>, vector<16x32xf32>
    %24 = vector.extract_strided_slice %21 {offsets = [0, 0], sizes = [16, 32], strides = [1, 1]} : vector<16x160xf32> to vector<16x32xf32>
    %25 = arith.mulf %24, %22 : vector<16x32xf32>
    %26 = vector.extract_strided_slice %21 {offsets = [0, 96], sizes = [16, 32], strides = [1, 1]} : vector<16x160xf32> to vector<16x32xf32>
    %27 = arith.mulf %26, %23 : vector<16x32xf32>
    %28 = arith.addf %25, %27 : vector<16x32xf32>
    %29 = vector.extract_strided_slice %21 {offsets = [0, 32], sizes = [16, 32], strides = [1, 1]} : vector<16x160xf32> to vector<16x32xf32>
    %30 = arith.mulf %29, %22 : vector<16x32xf32>
    %31 = vector.extract_strided_slice %21 {offsets = [0, 128], sizes = [16, 32], strides = [1, 1]} : vector<16x160xf32> to vector<16x32xf32>
    %32 = arith.mulf %31, %23 : vector<16x32xf32>
    %33 = arith.addf %30, %32 : vector<16x32xf32>
    %34 = vector.extract_strided_slice %21 {offsets = [0, 64], sizes = [16, 32], strides = [1, 1]} : vector<16x160xf32> to vector<16x32xf32>
    %35 = vector.extract_strided_slice %28 {offsets = [0, 0], sizes = [16, 8], strides = [1, 1]} : vector<16x32xf32> to vector<16x8xf32>
    %36 = vector.extract_strided_slice %28 {offsets = [0, 8], sizes = [16, 8], strides = [1, 1]} : vector<16x32xf32> to vector<16x8xf32>
    %37 = vector.extract_strided_slice %28 {offsets = [0, 16], sizes = [16, 8], strides = [1, 1]} : vector<16x32xf32> to vector<16x8xf32>
    %38 = vector.extract_strided_slice %28 {offsets = [0, 24], sizes = [16, 8], strides = [1, 1]} : vector<16x32xf32> to vector<16x8xf32>
    %39 = tpu.concatenate %35, %36, %37, %38 in 0 : vector<16x8xf32>, vector<16x8xf32>, vector<16x8xf32>, vector<16x8xf32> -> vector<64x8xf32>
    %40 = arith.truncf %39 : vector<64x8xf32> to vector<64x8xbf16>
    %41 = vector.extract_strided_slice %33 {offsets = [0, 0], sizes = [16, 8], strides = [1, 1]} : vector<16x32xf32> to vector<16x8xf32>
    %42 = vector.extract_strided_slice %33 {offsets = [0, 8], sizes = [16, 8], strides = [1, 1]} : vector<16x32xf32> to vector<16x8xf32>
    %43 = vector.extract_strided_slice %33 {offsets = [0, 16], sizes = [16, 8], strides = [1, 1]} : vector<16x32xf32> to vector<16x8xf32>
    %44 = vector.extract_strided_slice %33 {offsets = [0, 24], sizes = [16, 8], strides = [1, 1]} : vector<16x32xf32> to vector<16x8xf32>
    %45 = tpu.concatenate %41, %42, %43, %44 in 0 : vector<16x8xf32>, vector<16x8xf32>, vector<16x8xf32>, vector<16x8xf32> -> vector<64x8xf32>
    %46 = arith.truncf %45 : vector<64x8xf32> to vector<64x8xbf16>
    %47 = vector.extract_strided_slice %34 {offsets = [0, 0], sizes = [16, 8], strides = [1, 1]} : vector<16x32xf32> to vector<16x8xf32>
    %48 = vector.extract_strided_slice %34 {offsets = [0, 8], sizes = [16, 8], strides = [1, 1]} : vector<16x32xf32> to vector<16x8xf32>
    %49 = vector.extract_strided_slice %34 {offsets = [0, 16], sizes = [16, 8], strides = [1, 1]} : vector<16x32xf32> to vector<16x8xf32>
    %50 = vector.extract_strided_slice %34 {offsets = [0, 24], sizes = [16, 8], strides = [1, 1]} : vector<16x32xf32> to vector<16x8xf32>
    %51 = tpu.concatenate %47, %48, %49, %50 in 0 : vector<16x8xf32>, vector<16x8xf32>, vector<16x8xf32>, vector<16x8xf32> -> vector<64x8xf32>
    %52 = arith.truncf %51 : vector<64x8xf32> to vector<64x8xbf16>
    "tpu.trace_start"() <{level = 10 : i32, message = "td,sd->ts"}> : () -> ()
    %cst_15 = arith.constant dense<0.000000e+00> : vector<64x64xf32>
    %53 = tpu.matmul %40, %46, %cst_15 {dimension_numbers = #tpu.dot_dimension_numbers<[1], [1], [0], [0], [0, 0, 1, 0], [], []>} : vector<64x8xbf16>, vector<64x8xbf16>, vector<64x64xf32> -> vector<64x64xf32>
    "tpu.trace_stop"() : () -> ()
    %cst_16 = arith.constant 0.353553385 : f32
    %54 = vector.broadcast %cst_16 : f32 to vector<64x64xf32>
    %55 = arith.mulf %53, %54 : vector<64x64xf32>
    %c0_17 = arith.constant 0 : index
    %c0_18 = arith.constant 0 : index
    %56 = vector.load %arg10[%c0_17, %c0_18] : memref<64x64xf32, #tpu.memory_space<vmem>>, vector<64x64xf32>
    %57 = arith.addf %55, %56 : vector<64x64xf32>
    %cst_19 = arith.constant dense<0xFF800000> : vector<64xf32>
    %58 = vector.multi_reduction <maximumf>, %57, %cst_19 [1] : vector<64x64xf32> to vector<64xf32>
    %59 = vector.shape_cast %58 : vector<64xf32> to vector<64x1xf32>
    %60 = vector.broadcast %59 : vector<64x1xf32> to vector<64x64xf32>
    %61 = arith.subf %57, %60 : vector<64x64xf32>
    %62 = math.exp %61 : vector<64x64xf32>
    %cst_20 = arith.constant dense<0.000000e+00> : vector<64xf32>
    %63 = vector.multi_reduction <add>, %62, %cst_20 [1] : vector<64x64xf32> to vector<64xf32>
    %64 = vector.shape_cast %63 : vector<64xf32> to vector<64x1xf32>
    %65 = tpu.reciprocal %64 {approx = true} : vector<64x1xf32> -> vector<64x1xf32>
    %66 = vector.broadcast %65 : vector<64x1xf32> to vector<64x64xf32>
    %67 = arith.mulf %62, %66 : vector<64x64xf32>
    %68 = arith.truncf %67 : vector<64x64xf32> to vector<64x64xbf16>
    %cst_21 = arith.constant dense<0.000000e+00> : vector<64x8xf32>
    %69 = tpu.matmul %68, %52, %cst_21 {dimension_numbers = #tpu.dot_dimension_numbers<[1], [0], [0], [1], [0, 0, 1, 1], [], []>} : vector<64x64xbf16>, vector<64x8xbf16>, vector<64x8xf32> -> vector<64x8xf32>
    %70 = vector.extract_strided_slice %69 {offsets = [0, 0], sizes = [16, 8], strides = [1, 1]} : vector<64x8xf32> to vector<16x8xf32>
    %71 = vector.extract_strided_slice %69 {offsets = [16, 0], sizes = [16, 8], strides = [1, 1]} : vector<64x8xf32> to vector<16x8xf32>
    %72 = vector.extract_strided_slice %69 {offsets = [32, 0], sizes = [16, 8], strides = [1, 1]} : vector<64x8xf32> to vector<16x8xf32>
    %73 = vector.extract_strided_slice %69 {offsets = [48, 0], sizes = [16, 8], strides = [1, 1]} : vector<64x8xf32> to vector<16x8xf32>
    %74 = tpu.concatenate %70, %71, %72, %73 in 1 : vector<16x8xf32>, vector<16x8xf32>, vector<16x8xf32>, vector<16x8xf32> -> vector<16x32xf32>
    %75 = arith.truncf %74 : vector<16x32xf32> to vector<16x32xbf16>
    %c0_22 = arith.constant 0 : index
    %c0_23 = arith.constant 0 : index
    %c0_24 = arith.constant 0 : index
    %76 = vector.load %arg3[%c0_22, %c0_23, %c0_24] : memref<1x32x32xbf16, #tpu.memory_space<vmem>>, vector<1x32x32xbf16>
    %77 = vector.shape_cast %76 : vector<1x32x32xbf16> to vector<32x32xbf16>
    %cst_25 = arith.constant dense<0.000000e+00> : vector<16x32xf32>
    %78 = tpu.matmul %75, %77, %cst_25 {dimension_numbers = #tpu.dot_dimension_numbers<[1], [0], [0], [1], [0, 0, 1, 1], [], []>} : vector<16x32xbf16>, vector<32x32xbf16>, vector<16x32xf32> -> vector<16x32xf32>
    %79 = arith.addf %3, %78 : vector<16x32xf32>
    %c0_26 = arith.constant 0 : index
    %c0_27 = arith.constant 0 : index
    %c0_28 = arith.constant 0 : index
    %80 = vector.load %arg7[%c0_26, %c0_27, %c0_28] : memref<1x1x32xf32, #tpu.memory_space<vmem>>, vector<1x1x32xf32>
    %81 = vector.shape_cast %80 : vector<1x1x32xf32> to vector<1x32xf32>
    %82 = arith.mulf %79, %79 : vector<16x32xf32>
    %cst_29 = arith.constant dense<0.000000e+00> : vector<16xf32>
    %83 = vector.multi_reduction <add>, %82, %cst_29 [1] : vector<16x32xf32> to vector<16xf32>
    %84 = vector.shape_cast %83 : vector<16xf32> to vector<16x1xf32>
    %cst_30 = arith.constant 3.200000e+01 : f32
    %85 = vector.broadcast %cst_30 : f32 to vector<16x1xf32>
    %86 = arith.divf %84, %85 : vector<16x1xf32>
    %cst_31 = arith.constant 9.99999997E-7 : f32
    %87 = vector.broadcast %cst_31 : f32 to vector<16x1xf32>
    %88 = arith.addf %86, %87 : vector<16x1xf32>
    %89 = math.rsqrt %88 : vector<16x1xf32>
    %90 = vector.broadcast %89 : vector<16x1xf32> to vector<16x32xf32>
    %91 = arith.mulf %79, %90 : vector<16x32xf32>
    %92 = vector.broadcast %81 : vector<1x32xf32> to vector<16x32xf32>
    %93 = arith.mulf %91, %92 : vector<16x32xf32>
    %94 = arith.truncf %93 : vector<16x32xf32> to vector<16x32xbf16>
    %c0_32 = arith.constant 0 : index
    %c0_33 = arith.constant 0 : index
    %c0_34 = arith.constant 0 : index
    %95 = vector.load %arg4[%c0_32, %c0_33, %c0_34] : memref<1x32x128xbf16, #tpu.memory_space<vmem>>, vector<1x32x128xbf16>
    %96 = vector.shape_cast %95 : vector<1x32x128xbf16> to vector<32x128xbf16>
    %cst_35 = arith.constant dense<0.000000e+00> : vector<16x128xf32>
    %97 = tpu.matmul %94, %96, %cst_35 {dimension_numbers = #tpu.dot_dimension_numbers<[1], [0], [0], [1], [0, 0, 1, 1], [], []>} : vector<16x32xbf16>, vector<32x128xbf16>, vector<16x128xf32> -> vector<16x128xf32>
    %98 = vector.extract_strided_slice %97 {offsets = [0, 0], sizes = [16, 64], strides = [1, 1]} : vector<16x128xf32> to vector<16x64xf32>
    %99 = vector.extract_strided_slice %97 {offsets = [0, 64], sizes = [16, 64], strides = [1, 1]} : vector<16x128xf32> to vector<16x64xf32>
    %cst_36 = arith.constant 0.000000e+00 : f32
    %100 = vector.broadcast %cst_36 : f32 to vector<16x64xf32>
    %101 = arith.subf %100, %98 : vector<16x64xf32>
    %102 = math.exp %101 : vector<16x64xf32>
    %cst_37 = arith.constant 1.000000e+00 : f32
    %103 = vector.broadcast %cst_37 : f32 to vector<16x64xf32>
    %104 = arith.addf %103, %102 : vector<16x64xf32>
    %105 = tpu.reciprocal %104 : vector<16x64xf32> -> vector<16x64xf32>
    %106 = arith.mulf %98, %105 : vector<16x64xf32>
    %107 = arith.mulf %106, %99 : vector<16x64xf32>
    %108 = arith.truncf %107 : vector<16x64xf32> to vector<16x64xbf16>
    %c0_38 = arith.constant 0 : index
    %c0_39 = arith.constant 0 : index
    %c0_40 = arith.constant 0 : index
    %109 = vector.load %arg5[%c0_38, %c0_39, %c0_40] : memref<1x64x32xbf16, #tpu.memory_space<vmem>>, vector<1x64x32xbf16>
    %110 = vector.shape_cast %109 : vector<1x64x32xbf16> to vector<64x32xbf16>
    %cst_41 = arith.constant dense<0.000000e+00> : vector<16x32xf32>
    %111 = tpu.matmul %108, %110, %cst_41 {dimension_numbers = #tpu.dot_dimension_numbers<[1], [0], [0], [1], [0, 0, 1, 1], [], []>} : vector<16x64xbf16>, vector<64x32xbf16>, vector<16x32xf32> -> vector<16x32xf32>
    %112 = arith.addf %79, %111 : vector<16x32xf32>
    %c0_42 = arith.constant 0 : index
    %c0_43 = arith.constant 0 : index
    %113 = vector.load %arg15[%c0_42, %c0_43] : memref<16x32xf32, #tpu.memory_space<vmem>>, vector<16x32xf32>
    tpu.vector_store %arg15[%c0_42, %c0_43], %112 {strides = array<i32>} : memref<16x32xf32, #tpu.memory_space<vmem>>, vector<16x32xf32>,
    %c1_i32 = arith.constant 1 : i32
    %114 = arith.cmpi eq, %arg0, %c1_i32 : i32
    %115 = arith.extui %114 : i1 to i32
    %c0_i32_44 = arith.constant 0 : i32
    %116 = arith.cmpi ne, %115, %c0_i32_44 : i32
    scf.if %116 {
      %cst_45 = arith.constant dense<0.000000e+00> : vector<16xf32>
      %117 = vector.multi_reduction <add>, %112, %cst_45 [1] : vector<16x32xf32> to vector<16xf32>
      %118 = vector.shape_cast %117 : vector<16xf32> to vector<16x1xf32>
      %cst_46 = arith.constant 3.200000e+01 : f32
      %119 = vector.broadcast %cst_46 : f32 to vector<16x1xf32>
      %120 = arith.divf %118, %119 : vector<16x1xf32>
      %121 = vector.broadcast %120 : vector<16x1xf32> to vector<16x32xf32>
      %122 = arith.subf %112, %121 : vector<16x32xf32>
      %123 = arith.mulf %122, %122 : vector<16x32xf32>
      %cst_47 = arith.constant dense<0.000000e+00> : vector<16xf32>
      %124 = vector.multi_reduction <add>, %123, %cst_47 [1] : vector<16x32xf32> to vector<16xf32>
      %125 = vector.shape_cast %124 : vector<16xf32> to vector<16x1xf32>
      %cst_48 = arith.constant 3.200000e+01 : f32
      %126 = vector.broadcast %cst_48 : f32 to vector<16x1xf32>
      %127 = arith.divf %125, %126 : vector<16x1xf32>
      %128 = vector.broadcast %120 : vector<16x1xf32> to vector<16x32xf32>
      %129 = arith.subf %112, %128 : vector<16x32xf32>
      %cst_49 = arith.constant 9.99999997E-7 : f32
      %130 = vector.broadcast %cst_49 : f32 to vector<16x1xf32>
      %131 = arith.addf %127, %130 : vector<16x1xf32>
      %132 = math.rsqrt %131 : vector<16x1xf32>
      %133 = vector.broadcast %132 : vector<16x1xf32> to vector<16x32xf32>
      %134 = arith.mulf %129, %133 : vector<16x32xf32>
      %c0_50 = arith.constant 0 : index
      %c0_51 = arith.constant 0 : index
      %135 = vector.load %arg11[%c0_50, %c0_51] : memref<1x32xf32, #tpu.memory_space<vmem>>, vector<1x32xf32>
      %136 = vector.broadcast %135 : vector<1x32xf32> to vector<16x32xf32>
      %137 = arith.mulf %134, %136 : vector<16x32xf32>
      %c0_52 = arith.constant 0 : index
      %c0_53 = arith.constant 0 : index
      %138 = vector.load %arg12[%c0_52, %c0_53] : memref<1x32xf32, #tpu.memory_space<vmem>>, vector<1x32xf32>
      %139 = vector.broadcast %138 : vector<1x32xf32> to vector<16x32xf32>
      %140 = arith.addf %137, %139 : vector<16x32xf32>
      %141 = arith.truncf %140 : vector<16x32xf32> to vector<16x32xbf16>
      %c0_54 = arith.constant 0 : index
      %c0_55 = arith.constant 0 : index
      %142 = vector.load %arg13[%c0_54, %c0_55] : memref<32x128xbf16, #tpu.memory_space<vmem>>, vector<32x128xbf16>
      %cst_56 = arith.constant dense<0.000000e+00> : vector<16x128xf32>
      %143 = tpu.matmul %141, %142, %cst_56 {dimension_numbers = #tpu.dot_dimension_numbers<[1], [0], [0], [1], [0, 0, 1, 1], [], []>} : vector<16x32xbf16>, vector<32x128xbf16>, vector<16x128xf32> -> vector<16x128xf32>
      %c0_57 = arith.constant 0 : index
      %c0_58 = arith.constant 0 : index
      %144 = vector.load %arg14[%c0_57, %c0_58] : memref<16x128xf32, #tpu.memory_space<vmem>>, vector<16x128xf32>
      tpu.vector_store %arg14[%c0_57, %c0_58], %143 {strides = array<i32>} : memref<16x128xf32, #tpu.memory_space<vmem>>, vector<16x128xf32>,
    } else {
    }
    return
  }
  func.func @transform_0(%arg0: i32) -> (i32, i32) {
    %c0_i32 = arith.constant 0 : i32
    %c0_i32_0 = arith.constant 0 : i32
    %c0_i32_1 = arith.constant 0 : i32
    return %c0_i32, %c0_i32_0 : i32, i32
  }
  func.func @transform_1(%arg0: i32) -> (i32, i32, i32) {
    %c0_i32 = arith.constant 0 : i32
    %c0_i32_0 = arith.constant 0 : i32
    %c0_i32_1 = arith.constant 0 : i32
    return %arg0, %c0_i32, %c0_i32_0 : i32, i32, i32
  }
  func.func @transform_2(%arg0: i32) -> (i32, i32, i32) {
    %c0_i32 = arith.constant 0 : i32
    %c0_i32_0 = arith.constant 0 : i32
    %c0_i32_1 = arith.constant 0 : i32
    return %arg0, %c0_i32, %c0_i32_0 : i32, i32, i32
  }
  func.func @transform_3(%arg0: i32) -> (i32, i32, i32) {
    %c0_i32 = arith.constant 0 : i32
    %c0_i32_0 = arith.constant 0 : i32
    %c0_i32_1 = arith.constant 0 : i32
    return %arg0, %c0_i32, %c0_i32_0 : i32, i32, i32
  }
  func.func @transform_4(%arg0: i32) -> (i32, i32, i32) {
    %c0_i32 = arith.constant 0 : i32
    %c0_i32_0 = arith.constant 0 : i32
    %c0_i32_1 = arith.constant 0 : i32
    return %arg0, %c0_i32, %c0_i32_0 : i32, i32, i32
  }
  func.func @transform_5(%arg0: i32) -> (i32, i32, i32) {
    %c0_i32 = arith.constant 0 : i32
    %c0_i32_0 = arith.constant 0 : i32
    %c0_i32_1 = arith.constant 0 : i32
    return %arg0, %c0_i32, %c0_i32_0 : i32, i32, i32
  }
  func.func @transform_6(%arg0: i32) -> (i32, i32, i32) {
    %c0_i32 = arith.constant 0 : i32
    %c0_i32_0 = arith.constant 0 : i32
    %c0_i32_1 = arith.constant 0 : i32
    return %arg0, %c0_i32, %c0_i32_0 : i32, i32, i32
  }
  func.func @transform_7(%arg0: i32) -> (i32, i32) {
    %c0_i32 = arith.constant 0 : i32
    %c0_i32_0 = arith.constant 0 : i32
    %c0_i32_1 = arith.constant 0 : i32
    return %c0_i32, %c0_i32_0 : i32, i32
  }
  func.func @transform_8(%arg0: i32) -> (i32, i32) {
    %c0_i32 = arith.constant 0 : i32
    %c0_i32_0 = arith.constant 0 : i32
    %c0_i32_1 = arith.constant 0 : i32
    return %c0_i32, %c0_i32_0 : i32, i32
  }
  func.func @transform_9(%arg0: i32) -> (i32, i32) {
    %c0_i32 = arith.constant 0 : i32
    %c0_i32_0 = arith.constant 0 : i32
    %c0_i32_1 = arith.constant 0 : i32
    return %c0_i32, %c0_i32_0 : i32, i32
  }
  func.func @transform_10(%arg0: i32) -> (i32, i32) {
    %c0_i32 = arith.constant 0 : i32
    %c0_i32_0 = arith.constant 0 : i32
    %c0_i32_1 = arith.constant 0 : i32
    return %c0_i32, %c0_i32_0 : i32, i32
  }
  func.func @transform_11(%arg0: i32) -> (i32, i32) {
    %c0_i32 = arith.constant 0 : i32
    %c0_i32_0 = arith.constant 0 : i32
    %c0_i32_1 = arith.constant 0 : i32
    return %c0_i32, %c0_i32_0 : i32, i32
  }
  func.func @transform_12(%arg0: i32) -> (i32, i32) {
    %c0_i32 = arith.constant 0 : i32
    %c0_i32_0 = arith.constant 0 : i32
    %c0_i32_1 = arith.constant 0 : i32
    return %c0_i32, %c0_i32_0 : i32, i32
  }
  func.func @transform_13(%arg0: i32) -> (i32, i32) {
    %c0_i32 = arith.constant 0 : i32
    %c0_i32_0 = arith.constant 0 : i32
    %c0_i32_1 = arith.constant 0 : i32
    return %c0_i32, %c0_i32_0 : i32, i32
  }
}

</mosaic_0001>

<bundles_post_ra>
// kernel: tpu_custom_call.1
= control target key start
LH: loop header
LB: loop body
LE: loop exit
PB: predicated region body
PF: predicated region fallthrough
CT: control target
= control target key end

     0   :  { %s2677_s0 = inlined_call_operand.hbm [shape: f32[16,32], index: 0, kind: input, shape index: {}]   ;;  %s2678_s1 = inlined_call_operand.vmem [shape: bf16[2,32,160], index: 1, kind: input, shape index: {}]   ;;  %s2679_s2 = inlined_call_operand.vmem [shape: bf16[2,32,32], index: 2, kind: input, shape index: {}]   ;;  %s2680_s3 = inlined_call_operand.hbm [shape: bf16[2,32,128], index: 3, kind: input, shape index: {}]   ;;  %s2681_s4 = inlined_call_operand.vmem [shape: bf16[2,64,32], index: 4, kind: input, shape index: {}]   ;;  %s2682_s5 = inlined_call_operand.vmem [shape: f32[2,1,32], index: 5, kind: input, shape index: {}]   ;;  %s2683_s6 = inlined_call_operand.vmem [shape: f32[2,1,32], index: 6, kind: input, shape index: {}]   ;;  %s2684_s7 = inlined_call_operand.hbm [shape: f32[16,32], index: 7, kind: input, shape index: {}]   ;;  %s2685_s8 = inlined_call_operand.hbm [shape: f32[16,32], index: 8, kind: input, shape index: {}]   ;;  %s2686_s9 = inlined_call_operand.hbm [shape: f32[64,64], index: 9, kind: input, shape index: {}]   ;;  %s2687_s10 = inlined_call_operand.vmem [shape: f32[1,32], index: 10, kind: input, shape index: {}]   ;;  %s2688_s11 = inlined_call_operand.vmem [shape: f32[1,32], index: 11, kind: input, shape index: {}]   ;;  %s2689_s12 = inlined_call_operand.hbm [shape: bf16[32,128], index: 12, kind: input, shape index: {}]   ;;  %s2690_s13 = inlined_call_operand.hbm [shape: f32[16,128], index: 13, kind: output, shape index: {}]  }
   0x1   :  { %2693 = sst [smem:[#allocation21_spill]] %s2677_s0 }
   0x2   :  { %2694 = sst [smem:[#allocation22_spill]] %s2684_s7 }
   0x3   :  { %2695 = sst [smem:[#allocation23_spill]] %s2685_s8 }
   0x4   :  { %2696 = sst [smem:[#allocation24_spill]] %s2687_s10 }
   0x5   :  { %2697 = sst [smem:[#allocation25_spill]] %s2688_s11 }
   0x6   :  { %2698 = sst [smem:[#allocation26_spill]] %s2690_s13 }
   0x7   :  { %18 = vsyncpa [#allocation4], 0 }
   0x8   :  { %19 = vsyncpa [#allocation7], 0 }
   0x9   :  { %21 = vsyncpa [#allocation7 + $0x1], 0 }
   0xa   :  { %22 = vsyncpa [#allocation10], 0 }
   0xb   :  { %23 = vsyncpa [#allocation13], 0 }
   0xc   :  { %24 = vsyncpa [#allocation5], 0  ;;  %s2308_s25 = smov 0   ;;  %s2310_s26 = smov 0  }
   0xd   :  { %s2312_s27 = smov 0   ;;  %s2314_s28 = smov 0  }
   0xe LB: > { %s2327_s29 = sadd.s32 4294967295, %s2215_s28   ;;  %p123_p0 = scmp.ne.s32.totalorder %s2207_s26, %s2203_s25  ;;  %s2215_s28 = sphi %s2314_s28, %s2716_s28   ;;  %s2211_s27 = sphi %s2312_s27, %s2715_s27   ;;  %s2207_s26 = sphi %s2310_s26, %s2714_s26   ;;  %s2203_s25 = sphi %s2308_s25, %s2713_s25  }
   0xf   : > { %p124_p1 = scmp.eq.s32.totalorder %s2327_s29, 0  ;;  %p1602_p2 = scmp.ge.s32.totalorder %s2215_s28, 1 }
  0x10   : > { %p359_p3 = scmp.lt.s32.totalorder %s2215_s28, 3  ;;  %p1603_p4 = scmp.ne.s32.totalorder %s2327_s29, 0 }
  0x11   : > { %p2336_p5 = por %p124_p1, %p123_p0  ;;  %s2701_s7 = sld [smem:[#allocation22_spill]] }
  0x12   : > { %p2340_p6 = pnand %p1602_p2, %p359_p3  ;;  %s2217_s18 = smov [#allocation8]  }
  0x13   : > { %s386_s19 = sshll.u32 %s2217_s18, 4  ;;  %s2703_s8 = sld [smem:[#allocation23_spill]]  ;;  %s387_s19 = int_to_ptr.vmem [resolvable:$true] %s386_s19 }
  0x14   : > { %p1749_p7 = pneg %p2340_p6  ;;  %s2218_s24 = smov 128  }
  0x15   : > { %s2219_s25 = smov 8   ;;  %s2220_s15 = smov [#allocation9]  }
  0x16   : > { %p2351_p8 = pnand %p1749_p7, %p124_p1  ;;  %s400_s16 = sshll.u32 %s2220_s15, 4  ;;  %s401_s16 = int_to_ptr.vmem [resolvable:$true] %s400_s16 }
  0x17   : > { %s384_s17 = sshll.u32 %s2701_s7, 4  ;;  %s2704_s0 = sld [smem:[#allocation21_spill]]  ;;  %s385_s17 = int_to_ptr.hbm [resolvable:$true] %s384_s17 }
  0x18   : > { %1755 = dma.hbm_to_vmem [thread:$0]  (!%p2351_p8), %s385_s17, 256, %s387_s19, [#allocation7], %s2218_s24, %s2218_s24, %s2219_s25  }
  0x19   : > { %s398_s23 = sshll.u32 %s2703_s8, 4  ;;  %s412_s22 = sshll.u32 %s2686_s9, 4  ;;  %s399_s23 = int_to_ptr.hbm [resolvable:$true] %s398_s23  ;;  %s413_s22 = int_to_ptr.hbm [resolvable:$true] %s412_s22 }
  0x1a   : > { %1758 = dma.hbm_to_vmem [thread:$0]  (!%p2351_p8), %s399_s23, 256, %s401_s16, [#allocation10], %s2218_s24, %s2218_s24, %s2219_s25  }
  0x1b   : > { %s2221_s8 = smov [#allocation3]   ;;  %s2222_s7 = smov [#allocation11]  }
  0x1c   : > { %s372_s10 = sshll.u32 %s2221_s8, 4  ;;  %s414_s17 = sshll.u32 %s2222_s7, 4  ;;  %s373_s10 = int_to_ptr.vmem [resolvable:$true] %s372_s10  ;;  %s415_s17 = int_to_ptr.vmem [resolvable:$true] %s414_s17 }
  0x1d   : > { %s370_s13 = sshll.u32 %s2704_s0, 4  ;;  %s432_s11 = sshll.u32 %s2689_s12, 4  ;;  %s371_s13 = int_to_ptr.hbm [resolvable:$true] %s370_s13  ;;  %s433_s11 = int_to_ptr.hbm [resolvable:$true] %s432_s11 }
  0x1e   : > { %1752 = dma.hbm_to_vmem [thread:$0]  (!%p2351_p8), %s371_s13, 256, %s373_s10, [#allocation4], %s2218_s24, %s2218_s24, %s2219_s25  }
  0x1f   : > { %1761 = dma.hbm_to_vmem [thread:$0]  (!%p2351_p8), %s413_s22, 1024, %s415_s17, [#allocation10], %s2218_s24, %s2218_s24, %s2219_s25  }
  0x20   : > { %s2223_s8 = smov [#allocation12]   ;;  %s2691_s10 = smov 64  }
  0x21   : > { %s434_s15 = sshll.u32 %s2223_s8, 4  ;;  %s2692_s13 = smov 4   ;;  %s435_s15 = int_to_ptr.vmem [resolvable:$true] %s434_s15 }
  0x22   : > { %1764 = dma.hbm_to_vmem [thread:$0]  (!%p2351_p8), %s433_s11, 256, %s435_s15, [#allocation13], %s2691_s10, %s2691_s10, %s2692_s13  }
  0x23   : > { %s2381_s16 = sadd.s32 1, %s2215_s28   ;;  %s110_s21 = sadd.s32 1, %s2211_s27 }
  0x24   : > { %s107_s18 = ssub.s32 %s2215_s28, %s2381_s16  ;;  %p117_p10 = scmp.ne.s32.totalorder %s2211_s27, %s2207_s26 }
  0x25   : > { %p108_p9 = scmp.eq.s32.totalorder %s107_s18, 0  ;;  %p118_p11 = scmp.eq.s32.totalorder %s2215_s28, 0 }
  0x26   : > { %p1774_p13 = scmp.lt.s32.totalorder %s2215_s28, 2  ;;  %s464_s25 = sand.u32 1, %s2215_s28  }
  0x27   : > { %s2390_s24 = scalar_select %p108_p9, %s2211_s27, %s110_s21  }
  0x28   : > { %p119_p12 = por %p118_p11, %p117_p10  ;;  %s466_s22 = sand.u32 1, %s2211_s27  }
  0x29   : > { %s1609_s7 = sshll.u32 %s466_s22, 4  ;;  %s1701_s20 = sshll.u32 %s2215_s28, 4 }
  0x2a   : > { %s473_s23 = scalar_lea.hbm %s2680_s3, %s1701_s20  ;;  %s468_s8 = scalar_lea.vmem [#allocation6], %s1609_s7 }
  0x2b   : > { %s474_s11 = sshll.u32 %s473_s23, 4  ;;  %s476_s15 = sshll.u32 %s468_s8, 4  ;;  %s475_s11 = int_to_ptr.hbm [resolvable:$true] %s474_s11  ;;  %s477_s15 = int_to_ptr.vmem [resolvable:$true] %s476_s15 }
  0x2c   : > { %p2399_p0 = pnand %p1774_p13, %p119_p12  ;;  %s465_s21 = scalar_lea.sflag [#allocation7], %s464_s25 }
  0x2d   : > { %s2103_s10 = sshra.s32 %s475_s11, 4  ;;  %s2110_s7 = scalar_lea.hbm %s2680_s3, 32  ;;  %s2104_s10 = int_to_ptr.hbm [resolvable:$true] %s2103_s10 }
  0x2e   : > { %s2105_s13 = scalar_lea.hbm %s2104_s10, 16  ;;  %p2107_p3 = pneg %p2399_p0 }
  0x2f   : > { %p2106_p2 = scmp.ne.s32.totalorder %s2104_s10, %s2105_s13  ;;  %p2111_p9 = scmp.lt.s32.totalorder %s2104_s10, %s2680_s3 }
  0x30   : > { %p2112_p10 = scmp.lt.s32.totalorder %s2110_s7, %s2105_s13 }
  0x31   : > { %p2108_p7 = pnand %p2107_p3, %p2106_p2 }
  0x32   : > { %p2113_p11 = por %p2112_p10, %p2111_p9 }
  0x33   : > { %p2109_p8 = pneg %p2108_p7 }
  0x35   : > { %p2114_p12 = pnand %p2113_p11, %p2109_p8 }
  0x37   : > { %2117 = shalt.err (!%p2114_p12)
}
  0x38   : > { %s2706_s25 = smov 4   ;;  %s2707_s19 = smov 64  }
  0x39   : > { %1768 = dma.hbm_to_vmem [thread:$0]  (!%p2399_p0), %s475_s11, 256, %s477_s15, %s465_s21, %s2707_s19, %s2707_s19, %s2706_s25  }
  0x3a   : > { %508 = sbr.rel (%p2340_p6) target bundleno = 2552 (0x9f8), region = 72 }
  0x3f   : > { %2178 = dma.done.wait (%p124_p1), [#allocation4], 256  }
  0x40   : > { %2180 = vsyncadd (%p124_p1), [#allocation4], 4294967040  ;;  %s515_s10 = sand.u32 1, %s2327_s29   ;;  %s517_s13 = sand.u32 1, %s2207_s26  }
  0x41   : > { %s2424_s23 = sshll.u32 %s517_s13, 4  ;;  %s516_s8 = scalar_lea.sflag [#allocation7], %s515_s10 }
  0x42   : > { %2182 = dma.done.wait (%p2336_p5), %s516_s8, 256  }
  0x43   : > { %2184 = vsyncadd (%p2336_p5), %s516_s8, 4294967040 }
  0x44   : > { %2186 = dma.done.wait (%p124_p1), [#allocation7], 256  }
  0x45   : > { %2188 = vsyncadd (%p124_p1), [#allocation7], 4294967040 }
  0x46   : > { %2190 = dma.done.wait (%p124_p1), [#allocation10], 1280  }
  0x47   : > { %2192 = vsyncadd (%p124_p1), [#allocation10], 4294966016 }
  0x48   : > { %2194 = dma.done.wait (%p124_p1), [#allocation13], 256  }
  0x49   : > { %2196 = vsyncadd (%p124_p1), [#allocation13], 4294967040  ;;  %p599_p5 = scmp.lt.s32.totalorder %s2327_s29, 1 }
  0x4b   : > { %s2445_s30 = scalar_select %p599_p5, %s2327_s29, 1 }
  0x4c   : > { %624 = sbr.rel (%p1603_p4) target bundleno = 84 (0x54), region = 100 }
  0x4d   : > { %s1702_s14 = sshll.u32 %s2445_s30, 5  ;;  %s1703_s11 = sshll.u32 %s2445_s30, 4 }
  0x4e   : > { %s2452_s28 = scalar_lea.vmem %s2678_s1, %s1702_s14  ;;  %s2457_s20 = scalar_lea.vmem %s2679_s2, %s1703_s11 }
  0x4f   : > { %s2462_s19 = scalar_lea.vmem %s2681_s4, %s1702_s14  ;;  %s616_s8 = scalar_lea.vmem %s2682_s5, %s2445_s30 }
  0x50   : > { %s619_s15 = scalar_lea.vmem %s2683_s6, %s2445_s30 }
  0x51   : > { %v625_v0 = vld [vmem:[#allocation3] sm:$0xff]  ;;  %vm627_vm0 = vcmask 261120   ;;  %v626_v1 = vld [vmem:[#allocation3 + $0x8] sm:$0xff] }
  0x52   : > { %628 = vst.msk [vmem:[#allocation2] sm:$0xff] %vm627_vm0, %v625_v0 }
  0x53   : > { %629 = vst.msk [vmem:[#allocation2 + $0x8] sm:$0xff] %vm627_vm0, %v626_v1 }
  0x54 PF: > { %vm635_vm1 = vcmask 261120   ;;  %v2226_v8 = vmov 32.0   ;;  %v1636_v14 = vld [vmem:[%s2452_s28 + $0x10] sm:$0xf]  ;;  %v1708_v15 = vld [vmem:[%s2452_s28 + $0x14] sm:$0xf0] }
  0x55   : > { %1897 = vrcp.f32 %v2226_v8  ;;  %v1707_v16 = vld [vmem:[%s2452_s28 + $0x14] sm:$0xf]  ;;  %v1637_v17 = vor.u32 %v1708_v15, %v1636_v14  ;;  %v1638_v18 = vld [vmem:[%s2452_s28 + $0x18] sm:$0xf0]  ;;  %v1628_v21 = vld [vmem:[%s2452_s28] sm:$0xf] }
  0x56   : > { %v1641_v19 = vor.u32 %v1707_v16, %v1638_v18  ;;  %v1706_v22 = vld [vmem:[%s2452_s28 + $0x4] sm:$0xf0]  ;;  %v1705_v23 = vld [vmem:[%s2452_s28 + $0x4] sm:$0xf]  ;;  %v1630_v25 = vld [vmem:[%s2452_s28 + $0x8] sm:$0xf0] }
  0x57   : > { %714 = vmatpush.bf16.msra.mxu0 %v1637_v17  ;;  %v1629_v24 = vor.u32 %v1706_v22, %v1628_v21  ;;  %v1633_v27 = vor.u32 %v1705_v23, %v1630_v25  ;;  %v2495_v30 = vld [vmem:[#allocation8] sm:$0xff]  ;;  %v738_v31 = vld [vmem:[#allocation9] sm:$0xff]  ;;  %s2227_s0 = smov 32   ;;  %s2228_s18 = smov 96   ;;  %v2501_v36 = vld [vmem:[#allocation8 + $0x8] sm:$0xff]  ;;  %vm868_vm9 = vcmask 64512  }
  0x58   : > { %728 = vmatpush.bf16.msra.mxu1 %v1641_v19  ;;  %764 = vrot.lane.b32.xlu1 %v2495_v30, %s2227_s0  ;;  %v739_v42 = vld [vmem:[#allocation9 + $0x8] sm:$0xff]  ;;  %v1895_v51 = vld [vmem:[%s616_s8] ss:$0 sm:$0xff]  ;;  %s2229_s21 = smov 112   ;;  %s2230_s28 = smov 104   ;;  %vm946_vm10 = vcmask 523264  }
  0x59   : > { %v2474_v2 = vld [vmem:[#allocation2] sm:$0xff]  ;;  %s2231_s22 = smov 120   ;;  %s2232_s7 = smov 64   ;;  %vm1122_vm11 = vcmask 130048   ;;  %vm1125_vm12 = vcmask 195584  }
  0x5a   : > { %v633_v3 = vmul.f32 %v2474_v2, %v2474_v2  ;;  %v2478_v4 = vld [vmem:[#allocation2 + $0x8] sm:$0xff]  ;;  %s2233_s17 = smov 8   ;;  %s2234_s25 = smov 16  }
  0x5b   : > { %v634_v6 = vmul.f32 %v2478_v4, %v2478_v4  ;;  %v1898_v9 = vpop.eup %1897  ;;  %715 = vmatpush.bf16.msra.mxu0 %v1629_v24  ;;  %s2235_s10 = smov 24   ;;  %p1687_p1 = scmp.ne.s32.totalorder %s2327_s29, 1 }
  0x5c   : > { %v636_v5 = vsel %vm635_vm1, %v633_v3, 0.0  ;;  %v643_v10 = vmul.f32 32.0, %v1898_v9  ;;  %vm647_vm2 = vweird.f32 %v1898_v9  ;;  %729 = vmatpush.bf16.msra.mxu1 %v1633_v27  ;;  %s2711_s14 = sld [smem:[#allocation25_spill]] (!%p1687_p1) }
  0x5d   : > { %637 = vadd.xlane.f32.xlu0 %v636_v5  ;;  %v639_v7 = vsel %vm635_vm1, %v634_v6, 0.0 }
  0x5e   : > { %v644_v11 = vsub.f32 1.0, %v643_v10 }
  0x60   : > { %v645_v12 = vmul.f32 %v1898_v9, %v644_v11  ;;  %766 = vrot.lane.b32.xlu1 %v2501_v36, %s2227_s0 }
  0x62   : > { %v646_v13 = vadd.f32 %v1898_v9, %v645_v12 }
  0x64   : > { %v2488_v20 = vsel %vm647_vm2, %v1898_v9, %v646_v13 }
  0x65   : > { %640 = vadd.xlane.f32.xlu0 %v639_v7 }
  0x68   : > { %746 = vrot.lane.b32.xlu1 %v739_v42, %s2228_s18 }
  0x79   : > { %744 = vrot.lane.b32.xlu0 %v738_v31, %s2228_s18 }
  0xca   : > { %v765_v62 = vpop.permute.xlu1 %764 }
  0xd0   : > { %v638_v26 = vpop.xlane.xlu0 %637 }
  0xd1   : > { %v649_v28 = vmul.f32 %v2488_v20, %v638_v26 }
  0xd2   : > { %v767_v1 = vpop.permute.xlu1 %766 }
  0xd3   : > { %v651_v29 = vadd.f32 1e-06, %v649_v28 }
  0xd5   : > { %1899 = vrsqrt.f32 %v651_v29  ;;  %vm659_vm4 = vweird.f32 %v651_v29 }
  0xd8   : > { %v641_v32 = vpop.xlane.xlu0 %640 }
  0xd9   : > { %v650_v33 = vmul.f32 %v2488_v20, %v641_v32 }
  0xda   : > { %v747_v13 = vpop.permute.xlu1 %746 }
  0xdb   : > { %v1900_v34 = vpop.eup %1899  ;;  %v652_v35 = vadd.f32 1e-06, %v650_v33 }
  0xdc   : > { %v654_v37 = vmul.f32 %v1900_v34, %v651_v29  ;;  %vm660_vm3 = vweird.f32 %v1900_v34 }
  0xdd   : > { %1901 = vrsqrt.f32 %v652_v35  ;;  %vm661_vm5 = vmor %vm659_vm4, %vm660_vm3  ;;  %vm669_vm7 = vweird.f32 %v652_v35 }
  0xde   : > { %v655_v38 = vmul.f32 %v1900_v34, %v654_v37 }
  0xe0   : > { %v656_v39 = vmul.f32 0.5, %v655_v38 }
  0xe2   : > { %v657_v40 = vsub.f32 1.5, %v656_v39 }
  0xe3   : > { %v1902_v41 = vpop.eup %1901 }
  0xe4   : > { %v664_v43 = vmul.f32 %v1902_v41, %v652_v35  ;;  %v658_v44 = vmul.f32 %v1900_v34, %v657_v40  ;;  %vm670_vm6 = vweird.f32 %v1902_v41 }
  0xe5   : > { %vm671_vm8 = vmor %vm669_vm7, %vm670_vm6 }
  0xe6   : > { %v665_v45 = vmul.f32 %v1902_v41, %v664_v43  ;;  %v662_v47 = vsel %vm661_vm5, %v1900_v34, %v658_v44 }
  0xe7   : > { %v673_v50 = vmul.f32 %v662_v47, %v2474_v2 }
  0xe8   : > { %v666_v46 = vmul.f32 0.5, %v665_v45 }
  0xe9   : > { %v678_v54 = vmul.f32 %v1895_v51, %v673_v50 }
  0xea   : > { %v667_v48 = vsub.f32 1.5, %v666_v46 }
  0xeb   : > { %v745_v11 = vpop.permute.xlu0 %744 }
  0xec   : > { %v668_v49 = vmul.f32 %v1902_v41, %v667_v48 }
  0xee   : > { %v672_v52 = vsel %vm671_vm8, %v1902_v41, %v668_v49 }
  0xef   : > { %v674_v53 = vmul.f32 %v672_v52, %v2478_v4 }
  0xf1   : > { %v679_v55 = vmul.f32 %v1895_v51, %v674_v53 }
  0xf3   : > { %v680_v56 = vpack.c.bf16 %v679_v55, %v678_v54 }
  0xf5   : > { %1642 = vmatmul.msk.bf16.vlgmr.msra.gmra.mxu0 %vm635_vm1, %v680_v56  ;;  %1643 = vmatmul.msk.bf16.vlgmr.msra.gmra.mxu1 %vm635_vm1, %v680_v56 }
 0x172   : > { %v731_v57 = vpop.f32.mrf.mxu1  ;;  %v2517_v61 = vpop.f32.mrf.mxu0 }
 0x173   : > { %v772_v58 = vmul.f32 %v738_v31, %v731_v57  ;;  %v770_v3 = vmul.f32 %v765_v62, %v2517_v61  ;;  %v750_v12 = vmul.f32 %v745_v11, %v2517_v61  ;;  %v740_v31 = vmul.f32 %v2495_v30, %v2517_v61  ;;  %v931_v11 = vld [vmem:[#allocation11 + $0x8] sm:$0xff] }
 0x175   : > { %776 = vrot.lane.b32.xlu2 %v772_v58, %s2227_s0 }
 0x17a   : > { %v733_v59 = vpop.f32.mrf.mxu1  ;;  %v2519_v0 = vpop.f32.mrf.mxu0 }
 0x17b   : > { %v773_v60 = vmul.f32 %v739_v42, %v733_v59  ;;  %v771_v5 = vmul.f32 %v767_v1, %v2519_v0  ;;  %v751_v14 = vmul.f32 %v747_v13, %v2519_v0  ;;  %v741_v29 = vmul.f32 %v2501_v36, %v2519_v0  ;;  %v930_v1 = vld [vmem:[#allocation11] sm:$0xff] }
 0x17c   : > { %v1865_v38 = vpack.i.bf16 %v2519_v0, %v2517_v61 }
 0x17d   : > { %778 = vrot.lane.b32.xlu2 %v773_v60, %s2227_s0 }
 0x1cf   : > { %v777_v63 = vpop.permute.xlu2 %776 }
 0x1d0   : > { %v782_v7 = vadd.f32 %v777_v63, %v770_v3 }
 0x1d7   : > { %v779_v6 = vpop.permute.xlu2 %778 }
 0x1d8   : > { %v783_v8 = vadd.f32 %v779_v6, %v771_v5 }
 0x1da   : > { %v1840_v9 = vpack.i.bf16 %v783_v8, %v782_v7  ;;  %v828_v10 = vpack.c.bf16 %v783_v8, %v782_v7  ;;  %v932_v8 = vld [vmem:[#allocation11 + $0x10] sm:$0xff] }
 0x1dc   : > { %1841 = vrot.lane.b32.xlu1 %v1840_v9, %s2229_s21  ;;  %1836 = vrot.lane.b32.xlu2 %v1840_v9, %s2230_s28 }
 0x1e4   : > { %1846 = vrot.lane.b32.xlu2 %v1840_v9, %s2231_s22  ;;  %754 = vrot.lane.b32.xlu1 %v750_v12, %s2227_s0 }
 0x1ec   : > { %756 = vrot.lane.b32.xlu2 %v751_v14, %s2227_s0 }
 0x236   : > { %v1837_v15 = vpop.permute.xlu2 %1836 }
 0x237   : > { %v1839_v16 = vunpack.i.h.bf16 %v1837_v15  ;;  %v1838_v17 = vunpack.i.l.bf16 %v1837_v15 }
 0x239   : > { %v831_v18 = vpack.c.bf16 %v1839_v16, %v1838_v17 }
 0x23b   : > { %866 = vrot.lane.b32.xlu0 %v831_v18, %s2228_s18  ;;  %v933_v18 = vld [vmem:[#allocation11 + $0x18] sm:$0xff] }
 0x23e   : > { %v1847_v19 = vpop.permute.xlu2 %1846 }
 0x23f   : > { %v1849_v21 = vunpack.i.h.bf16 %v1847_v19  ;;  %v1848_v22 = vunpack.i.l.bf16 %v1847_v19 }
 0x241   : > { %v829_v23 = vpack.c.bf16 %v1849_v21, %v1848_v22 }
 0x243   : > { %860 = vrot.lane.b32.xlu0 %v828_v10, %s2228_s18  ;;  %862 = vrot.lane.b32.xlu2 %v829_v23, %s2228_s18 }
 0x246   : > { %v757_v28 = vpop.permute.xlu2 %756 }
 0x247   : > { %v761_v33 = vadd.f32 %v757_v28, %v741_v29  ;;  %v935_v29 = vld [vmem:[#allocation11 + $0x28] sm:$0xff] }
 0x24e   : > { %v1842_v24 = vpop.permute.xlu1 %1841 }
 0x24f   : > { %v1844_v25 = vunpack.i.h.bf16 %v1842_v24  ;;  %v1843_v26 = vunpack.i.l.bf16 %v1842_v24  ;;  %v934_v24 = vld [vmem:[#allocation11 + $0x20] sm:$0xff] }
 0x251   : > { %v830_v27 = vpack.c.bf16 %v1844_v25, %v1843_v26 }
 0x253   : > { %864 = vrot.lane.b32.xlu1 %v830_v27, %s2228_s18 }
 0x256   : > { %v755_v32 = vpop.permute.xlu1 %754 }
 0x257   : > { %v760_v34 = vadd.f32 %v755_v32, %v740_v31 }
 0x259   : > { %v1860_v35 = vpack.i.bf16 %v761_v33, %v760_v34  ;;  %v804_v37 = vpack.c.bf16 %v761_v33, %v760_v34 }
 0x25b   : > { %1861 = vrot.lane.b32.xlu0 %v1860_v35, %s2230_s28  ;;  %1856 = vrot.lane.b32.xlu2 %v1860_v35, %s2229_s21 }
 0x25c   : > { %1851 = vrot.lane.b32.xlu1 %v1860_v35, %s2231_s22  ;;  %v936_v35 = vld [vmem:[#allocation11 + $0x30] sm:$0xff] }
 0x263   : > { %1866 = vrot.lane.b32.xlu0 %v1865_v38, %s2230_s28 }
 0x26b   : > { %1871 = vrot.lane.b32.xlu0 %v1865_v38, %s2229_s21 }
 0x273   : > { %1876 = vrot.lane.b32.xlu0 %v1865_v38, %s2231_s22 }
 0x29d   : > { %v863_v42 = vpop.permute.xlu2 %862 }
 0x29e   : > { %v885_v44 = vsel %vm868_vm9, %v863_v42, 0 }
 0x2ad   : > { %v867_v30 = vpop.permute.xlu0 %866 }
 0x2ae   : > { %v891_v36 = vsel %vm868_vm9, %v867_v30, 0 }
 0x2af   : > { %897 = vmatpush.bf16.xpose.msrb.mxu1 %v891_v36  ;;  %1719 = vmatpush.bf16.xpose.msra.mxu2 %v891_v36 }
 0x2b5   : > { %v861_v39 = vpop.permute.xlu0 %860  ;;  %v1857_v54 = vpop.permute.xlu2 %1856 }
 0x2b6   : > { %v882_v49 = vsel %vm868_vm9, %v861_v39, 0  ;;  %v1859_v55 = vunpack.i.h.bf16 %v1857_v54  ;;  %v1858_v56 = vunpack.i.l.bf16 %v1857_v54  ;;  %v937_v39 = vld [vmem:[#allocation11 + $0x38] sm:$0xff] }
 0x2b8   : > { %v806_v57 = vpack.c.bf16 %v1859_v55, %v1858_v56 }
 0x2c5   : > { %v865_v40 = vpop.permute.xlu1 %864 }
 0x2c6   : > { %v888_v41 = vsel %vm868_vm9, %v865_v40, 0 }
 0x2c7   : > { %898 = vmatpush.bf16.xpose.msrb.mxu1 %v888_v41  ;;  %1720 = vmatpush.bf16.xpose.msra.mxu2 %v888_v41 }
 0x2cd   : > { %v1862_v43 = vpop.permute.xlu0 %1861 }
 0x2ce   : > { %v1852_v45 = vpop.permute.xlu1 %1851  ;;  %v1864_v58 = vunpack.i.h.bf16 %v1862_v43  ;;  %v1863_v59 = vunpack.i.l.bf16 %v1862_v43  ;;  %v852_v43 = vpack.c.bf16 %v2519_v0, %v2517_v61 }
 0x2cf   : > { %899 = vmatpush.bf16.xpose.msrb.mxu1 %v885_v44  ;;  %1721 = vmatpush.bf16.xpose.msra.mxu2 %v885_v44  ;;  %v1854_v50 = vunpack.i.h.bf16 %v1852_v45  ;;  %v1853_v51 = vunpack.i.l.bf16 %v1852_v45 }
 0x2d0   : > { %v807_v60 = vpack.c.bf16 %v1864_v58, %v1863_v59 }
 0x2d1   : > { %v805_v53 = vpack.c.bf16 %v1854_v50, %v1853_v51 }
 0x2d5   : > { %v1867_v46 = vpop.permute.xlu0 %1866 }
 0x2d6   : > { %v1869_v47 = vunpack.i.h.bf16 %v1867_v46  ;;  %v1868_v48 = vunpack.i.l.bf16 %v1867_v46 }
 0x2d7   : > { %900 = vmatpush.bf16.xpose.msrb.mxu1 %v882_v49  ;;  %1722 = vmatpush.bf16.xpose.msra.mxu2 %v882_v49 }
 0x2d8   : > { %v855_v52 = vpack.c.bf16 %v1869_v47, %v1868_v48 }
 0x2da   : > { %1049 = vrot.lane.b32.xlu1 %v855_v52, %s2232_s7 }
 0x2dd   : > { %v1872_v44 = vpop.permute.xlu0 %1871 }
 0x2de   : > { %1644 = vmatmul.msk.bf16.vlgmr.msrb.gmra.mxu1 %vm868_vm9, %v804_v37  ;;  %1645 = vmatmul.msk.bf16.vlgmr.msra.gmra.mxu2 %vm868_vm9, %v805_v53 }
 0x2e5   : > { %v1877_v45 = vpop.permute.xlu0 %1876 }
 0x2ee   : > { %1646 = vmatmul.msk.bf16.gmra.mxu2 %vm868_vm9, %v806_v57 }
 0x2fe   : > { %1647 = vmatmul.msk.bf16.gmra.mxu2 %vm868_vm9, %v807_v60 }
 0x34c   : > { %v1050_v62 = vpop.permute.xlu1 %1049 }
 0x34d   : > { %1071 = vmatpush.bf16.msra.mxu3 %v1050_v62  ;;  %v1874_v62 = vunpack.i.h.bf16 %v1872_v44 }
 0x35b   : > { %v902_v63 = vpop.f32.mrf.mxu1 }
 0x35c   : > { %v922_v3 = vmul.f32 0.35355338, %v902_v63  ;;  %v1873_v63 = vunpack.i.l.bf16 %v1872_v44 }
 0x35e   : > { %v938_v5 = vadd.f32 %v930_v1, %v922_v3 }
 0x360   : > { %v947_v6 = vsel %vm946_vm10, %v938_v5, -inf }
 0x361   : > { %v907_v7 = vpop.f32.mrf.mxu2  ;;  %948 = vmax.xlane.f32.xlu1 %v947_v6  ;;  %v1879_v6 = vunpack.i.h.bf16 %v1877_v45 }
 0x362   : > { %v924_v9 = vmul.f32 0.35355338, %v907_v7  ;;  %v1878_v7 = vunpack.i.l.bf16 %v1877_v45 }
 0x363   : > { %v904_v10 = vpop.f32.mrf.mxu1 }
 0x364   : > { %v923_v12 = vmul.f32 0.35355338, %v904_v10  ;;  %v940_v13 = vadd.f32 %v932_v8, %v924_v9  ;;  %v853_v8 = vpack.c.bf16 %v1879_v6, %v1878_v7 }
 0x366   : > { %v953_v14 = vsel %vm946_vm10, %v940_v13, -inf  ;;  %v939_v15 = vadd.f32 %v931_v11, %v923_v12 }
 0x367   : > { %954 = vmax.xlane.f32.xlu0 %v953_v14 }
 0x368   : > { %v950_v16 = vsel %vm946_vm10, %v939_v15, -inf }
 0x369   : > { %v909_v17 = vpop.f32.mrf.mxu2  ;;  %951 = vmax.xlane.f32.xlu2 %v950_v16 }
 0x36a   : > { %v925_v19 = vmul.f32 0.35355338, %v909_v17 }
 0x36c   : > { %v2558_v21 = vadd.f32 %v933_v18, %v925_v19 }
 0x36e   : > { %v956_v22 = vsel %vm946_vm10, %v2558_v21, -inf }
 0x371   : > { %v912_v23 = vpop.f32.mrf.mxu2  ;;  %957 = vmax.xlane.f32.xlu2 %v956_v22 }
 0x372   : > { %v926_v25 = vmul.f32 0.35355338, %v912_v23 }
 0x374   : > { %v2562_v26 = vadd.f32 %v934_v24, %v926_v25 }
 0x376   : > { %v959_v27 = vsel %vm946_vm10, %v2562_v26, -inf }
 0x377   : > { %960 = vmax.xlane.f32.xlu1 %v959_v27 }
 0x379   : > { %v914_v28 = vpop.f32.mrf.mxu2 }
 0x37a   : > { %v927_v31 = vmul.f32 0.35355338, %v914_v28 }
 0x37c   : > { %v943_v32 = vadd.f32 %v935_v29, %v927_v31 }
 0x37e   : > { %v962_v33 = vsel %vm946_vm10, %v943_v32, -inf }
 0x37f   : > { %963 = vmax.xlane.f32.xlu2 %v962_v33 }
 0x381   : > { %v917_v34 = vpop.f32.mrf.mxu2 }
 0x382   : > { %v928_v37 = vmul.f32 0.35355338, %v917_v34 }
 0x384   : > { %v944_v38 = vadd.f32 %v936_v35, %v928_v37 }
 0x386   : > { %v965_v30 = vsel %vm946_vm10, %v944_v38, -inf }
 0x387   : > { %966 = vmax.xlane.f32.xlu1 %v965_v30 }
 0x389   : > { %v919_v36 = vpop.f32.mrf.mxu2 }
 0x38a   : > { %v929_v40 = vmul.f32 0.35355338, %v919_v36 }
 0x38c   : > { %v945_v41 = vadd.f32 %v937_v39, %v929_v40 }
 0x38e   : > { %v968_v42 = vsel %vm946_vm10, %v945_v41, -inf }
 0x38f   : > { %969 = vmax.xlane.f32.xlu2 %v968_v42 }
 0x3a0   : > { %1043 = vrot.lane.b32.xlu1 %v852_v43, %s2232_s7 }
 0x3d4   : > { %v949_v46 = vpop.xlane.xlu1 %948 }
 0x3d5   : > { %v971_v47 = vsub.f32 %v938_v5, %v949_v46  ;;  %v854_v5 = vpack.c.bf16 %v1874_v62, %v1873_v63 }
 0x3d7   : > { %v979_v48 = vmul.f32 1.442695, %v971_v47 }
 0x3d9   : > { %1903 = vpow2.f32 %v979_v48 }
 0x3da   : > { %v955_v49 = vpop.xlane.xlu0 %954 }
 0x3db   : > { %v973_v50 = vsub.f32 %v940_v13, %v955_v49 }
 0x3dc   : > { %v952_v51 = vpop.xlane.xlu2 %951 }
 0x3dd   : > { %v983_v52 = vmul.f32 1.442695, %v973_v50  ;;  %v972_v53 = vsub.f32 %v939_v15, %v952_v51 }
 0x3df   : > { %v2572_v54 = vpop.eup %1903  ;;  %1905 = vpow2.f32 %v983_v52  ;;  %v981_v55 = vmul.f32 1.442695, %v972_v53 }
 0x3e0   : > { %v995_v61 = vsel %vm946_vm10, %v2572_v54, 0.0 }
 0x3e1   : > { %1907 = vpow2.f32 %v981_v55  ;;  %996 = vadd.xlane.f32.xlu2 %v995_v61 }
 0x3e4   : > { %v958_v59 = vpop.xlane.xlu2 %957 }
 0x3e5   : > { %v2576_v0 = vpop.eup %1905  ;;  %v974_v12 = vsub.f32 %v2558_v21, %v958_v59 }
 0x3e6   : > { %v1001_v56 = vsel %vm946_vm10, %v2576_v0, 0.0 }
 0x3e7   : > { %v1908_v57 = vpop.eup %1907  ;;  %1002 = vadd.xlane.f32.xlu1 %v1001_v56  ;;  %v985_v13 = vmul.f32 1.442695, %v974_v12  ;;  %v1709_v12 = vld [vmem:[%s2457_s20] sm:$0xff] }
 0x3e8   : > { %v998_v58 = vsel %vm946_vm10, %v1908_v57, 0.0 }
 0x3e9   : > { %999 = vadd.xlane.f32.xlu0 %v998_v58 }
 0x3ea   : > { %v961_v11 = vpop.xlane.xlu1 %960 }
 0x3eb   : > { %v975_v14 = vsub.f32 %v2562_v26, %v961_v11  ;;  %v1710_v11 = vld [vmem:[%s2457_s20 + $0x8] sm:$0xff]  ;;  %s2708_s20 = scalar_lea.vmem [#allocation6], %s2424_s23 }
 0x3ec   : > { %1154 = vmatpush.bf16.msrb.mxu0 %v1710_v11  ;;  %s2709_s13 = smov %s2708_s20  ;;  %v1715_v11 = vld [vmem:[%s2462_s19 + $0x10] sm:$0xff] }
 0x3ed   : > { %v987_v17 = vmul.f32 1.442695, %v975_v14 }
 0x3f0   : > { %1155 = vmatpush.bf16.msrb.mxu0 %v1709_v12 }
 0x3f2   : > { %v964_v60 = vpop.xlane.xlu2 %963 }
 0x3f3   : > { %v976_v1 = vsub.f32 %v943_v32, %v964_v60 }
 0x3f5   : > { %v989_v3 = vmul.f32 1.442695, %v976_v1 }
 0x3f7   : > { %1909 = vpow2.f32 %v989_v3 }
 0x3f8   : > { %1911 = vpow2.f32 %v985_v13 }
 0x3f9   : > { %1047 = vrot.lane.b32.xlu2 %v854_v5, %s2232_s7  ;;  %1913 = vpow2.f32 %v987_v17 }
 0x3fa   : > { %v967_v15 = vpop.xlane.xlu1 %966 }
 0x3fb   : > { %v977_v16 = vsub.f32 %v944_v38, %v967_v15 }
 0x3fd   : > { %v2582_v9 = vpop.eup %1909  ;;  %1045 = vrot.lane.b32.xlu0 %v853_v8, %s2232_s7  ;;  %v991_v19 = vmul.f32 1.442695, %v977_v16 }
 0x3fe   : > { %v1010_v10 = vsel %vm946_vm10, %v2582_v9, 0.0  ;;  %v1912_v23 = vpop.eup %1911 }
 0x3ff   : > { %1011 = vadd.xlane.f32.xlu1 %v1010_v10  ;;  %1915 = vpow2.f32 %v991_v19  ;;  %v1004_v25 = vsel %vm946_vm10, %v1912_v23, 0.0  ;;  %v1914_v27 = vpop.eup %1913 }
 0x400   : > { %v1007_v28 = vsel %vm946_vm10, %v1914_v27, 0.0 }
 0x402   : > { %v970_v18 = vpop.xlane.xlu2 %969 }
 0x403   : > { %v978_v22 = vsub.f32 %v945_v41, %v970_v18 }
 0x405   : > { %v993_v24 = vmul.f32 1.442695, %v978_v22  ;;  %v1916_v21 = vpop.eup %1915 }
 0x406   : > { %v1013_v26 = vsel %vm946_vm10, %v1916_v21, 0.0 }
 0x407   : > { %1917 = vpow2.f32 %v993_v24 }
 0x40d   : > { %v1918_v29 = vpop.eup %1917 }
 0x40e   : > { %v1016_v31 = vsel %vm946_vm10, %v1918_v29, 0.0 }
 0x412   : > { %v1044_v36 = vpop.permute.xlu1 %1043 }
 0x422   : > { %1005 = vadd.xlane.f32.xlu2 %v1004_v25 }
 0x427   : > { %1008 = vadd.xlane.f32.xlu0 %v1007_v28 }
 0x42a   : > { %1014 = vadd.xlane.f32.xlu2 %v1013_v26 }
 0x42f   : > { %1017 = vadd.xlane.f32.xlu0 %v1016_v31 }
 0x454   : > { %v997_v32 = vpop.xlane.xlu2 %996 }
 0x45a   : > { %v1003_v41 = vpop.xlane.xlu1 %1002 }
 0x45c   : > { %v1048_v33 = vpop.permute.xlu2 %1047  ;;  %v1000_v34 = vpop.xlane.xlu0 %999 }
 0x45d   : > { %1072 = vmatpush.bf16.msra.mxu3 %v1048_v33  ;;  %1919 = vrcp.f32 %v1000_v34 }
 0x45e   : > { %1921 = vrcp.f32 %v997_v32 }
 0x45f   : > { %1923 = vrcp.f32 %v1003_v41 }
 0x463   : > { %v1920_v35 = vpop.eup %1919 }
 0x464   : > { %v1922_v38 = vpop.eup %1921  ;;  %v1028_v30 = vmul.f32 %v1920_v35, %v1908_v57 }
 0x465   : > { %v1027_v39 = vmul.f32 %v1922_v38, %v2572_v54  ;;  %v1924_v43 = vpop.eup %1923 }
 0x466   : > { %v1029_v45 = vmul.f32 %v1924_v43, %v2576_v0 }
 0x467   : > { %v1035_v40 = vpack.c.bf16 %v1028_v30, %v1027_v39 }
 0x46f   : > { %v1046_v37 = vpop.permute.xlu0 %1045 }
 0x470   : > { %1073 = vmatpush.bf16.msra.mxu3 %v1046_v37 }
 0x472   : > { %v1012_v49 = vpop.xlane.xlu1 %1011 }
 0x474   : > { %1074 = vmatpush.bf16.msra.mxu3 %v1044_v36  ;;  %v1712_v36 = vld [vmem:[%s2708_s20 + $0x8] sm:$0xff] }
 0x475   : > { %1230 = vmatpush.bf16.msra.mxu1 %v1712_v36 }
 0x477   : > { %1648 = vmatmul.msk.bf16.vlgmr.msra.gmra.mxu3 %vm946_vm10, %v1035_v40  ;;  %v1711_v40 = vld [vmem:[%s2709_s13] sm:$0xff] }
 0x479   : > { %1231 = vmatpush.bf16.msra.mxu1 %v1711_v40 }
 0x495   : > { %v1006_v42 = vpop.xlane.xlu2 %1005 }
 0x496   : > { %1925 = vrcp.f32 %v1006_v42 }
 0x49a   : > { %v1009_v47 = vpop.xlane.xlu0 %1008 }
 0x49b   : > { %1927 = vrcp.f32 %v1009_v47 }
 0x49c   : > { %v1926_v44 = vpop.eup %1925  ;;  %1929 = vrcp.f32 %v1012_v49 }
 0x49d   : > { %v1030_v46 = vmul.f32 %v1926_v44, %v1912_v23  ;;  %v1015_v61 = vpop.xlane.xlu2 %1014 }
 0x49f   : > { %v1036_v48 = vpack.c.bf16 %v1030_v46, %v1029_v45 }
 0x4a1   : > { %1649 = vmatmul.msk.bf16.gmra.mxu3 %vm946_vm10, %v1036_v48  ;;  %v1928_v50 = vpop.eup %1927 }
 0x4a2   : > { %v1930_v51 = vpop.eup %1929  ;;  %v1031_v52 = vmul.f32 %v1928_v50, %v1914_v27  ;;  %v1018_v54 = vpop.xlane.xlu0 %1017 }
 0x4a3   : > { %v1032_v53 = vmul.f32 %v1930_v51, %v2582_v9  ;;  %1931 = vrcp.f32 %v1018_v54 }
 0x4a4   : > { %1933 = vrcp.f32 %v1015_v61 }
 0x4a5   : > { %v1037_v55 = vpack.c.bf16 %v1032_v53, %v1031_v52 }
 0x4a9   : > { %v1932_v0 = vpop.eup %1931 }
 0x4aa   : > { %v1934_v56 = vpop.eup %1933  ;;  %v1034_v57 = vmul.f32 %v1932_v0, %v1918_v29  ;;  %v1896_v0 = vld [vmem:[%s619_s15] ss:$0 sm:$0xff]  ;;  %s2710_s15 = sld [smem:[#allocation24_spill]] (!%p1687_p1) }
 0x4ab   : > { %v1033_v58 = vmul.f32 %v1934_v56, %v1916_v21 }
 0x4ad   : > { %v1038_v59 = vpack.c.bf16 %v1034_v57, %v1033_v58 }
 0x4b1   : > { %1650 = vmatmul.msk.bf16.gmra.mxu3 %vm946_vm10, %v1037_v55 }
 0x4c1   : > { %1651 = vmatmul.msk.bf16.gmra.mxu3 %vm946_vm10, %v1038_v59 }
 0x4fa   : > { %v1076_v60 = vpop.f32.mrf.mxu3 }
 0x502   : > { %v1078_v62 = vpop.f32.mrf.mxu3 }
 0x524   : > { %v1081_v63 = vpop.f32.mrf.mxu3 }
 0x52c   : > { %v1083_v1 = vpop.f32.mrf.mxu3 }
 0x52d   : > { %v1880_v3 = vpack.i.bf16 %v1083_v1, %v1081_v63  ;;  %v1716_v1 = vld [vmem:[%s2462_s19 + $0x18] sm:$0xff] }
 0x52e   : > { %1326 = vmatpush.bf16.msra.mxu0 %v1716_v1 }
 0x52f   : > { %1881 = vrot.lane.b32.xlu1 %v1880_v3, %s2233_s17 }
 0x532   : > { %1327 = vmatpush.bf16.msra.mxu0 %v1715_v11 }
 0x534   : > { %v1086_v5 = vpop.f32.mrf.mxu3 }
 0x53c   : > { %v1088_v6 = vpop.f32.mrf.mxu3 }
 0x53d   : > { %v1885_v7 = vpack.i.bf16 %v1088_v6, %v1086_v5 }
 0x53f   : > { %1886 = vrot.lane.b32.xlu2 %v1885_v7, %s2234_s25 }
 0x544   : > { %v1091_v8 = vpop.f32.mrf.mxu3 }
 0x54c   : > { %v1093_v9 = vpop.f32.mrf.mxu3 }
 0x54d   : > { %v1890_v10 = vpack.i.bf16 %v1093_v9, %v1091_v8 }
 0x54f   : > { %1891 = vrot.lane.b32.xlu0 %v1890_v10, %s2235_s10 }
 0x599   : > { %v1887_v16 = vpop.permute.xlu2 %1886 }
 0x59a   : > { %v1889_v19 = vunpack.i.h.bf16 %v1887_v16  ;;  %v1888_v22 = vunpack.i.l.bf16 %v1887_v16 }
 0x5a1   : > { %v1882_v13 = vpop.permute.xlu1 %1881 }
 0x5a2   : > { %v1884_v14 = vunpack.i.h.bf16 %v1882_v13  ;;  %v1883_v15 = vunpack.i.l.bf16 %v1882_v13  ;;  %v1714_v13 = vld [vmem:[%s2462_s19 + $0x8] sm:$0xff] }
 0x5a3   : > { %1328 = vmatpush.bf16.msra.mxu0 %v1714_v13 }
 0x5a4   : > { %v1121_v17 = vsel %vm868_vm9, %v1078_v62, %v1884_v14  ;;  %v1120_v18 = vsel %vm868_vm9, %v1076_v60, %v1883_v15  ;;  %v1713_v15 = vld [vmem:[%s2462_s19] sm:$0xff] }
 0x5a5   : > { %v1123_v27 = vsel %vm1122_vm11, %v1120_v18, %v1888_v22  ;;  %v1124_v21 = vsel %vm1122_vm11, %v1121_v17, %v1889_v19 }
 0x5a7   : > { %1329 = vmatpush.bf16.msra.mxu0 %v1713_v15 }
 0x5c1   : > { %v1892_v23 = vpop.permute.xlu0 %1891 }
 0x5c2   : > { %v1894_v24 = vunpack.i.h.bf16 %v1892_v23  ;;  %v1893_v25 = vunpack.i.l.bf16 %v1892_v23 }
 0x5c4   : > { %v1126_v28 = vsel %vm1125_vm12, %v1123_v27, %v1893_v25  ;;  %v1127_v26 = vsel %vm1125_vm12, %v1124_v21, %v1894_v24 }
 0x5c5   : > { %v1128_v29 = vpack.c.bf16 %v1127_v26, %v1126_v28 }
 0x5c7   : > { %1660 = vmatmul.msk.bf16.vlgmr.msrb.gmra.mxu0 %vm635_vm1, %v1128_v29 }
 0x644   : > { %v1157_v31 = vpop.f32.mrf.mxu0 }
 0x645   : > { %v2607_v32 = vadd.f32 %v1157_v31, %v2474_v2 }
 0x647   : > { %v1165_v33 = vmul.f32 %v2607_v32, %v2607_v32 }
 0x649   : > { %v1167_v34 = vsel %vm635_vm1, %v1165_v33, 0.0 }
 0x64a   : > { %1168 = vadd.xlane.f32.xlu1 %v1167_v34 }
 0x64c   : > { %v1159_v35 = vpop.f32.mrf.mxu0 }
 0x64d   : > { %v2613_v37 = vadd.f32 %v1159_v35, %v2478_v4 }
 0x64f   : > { %v1166_v38 = vmul.f32 %v2613_v37, %v2613_v37 }
 0x651   : > { %v1170_v30 = vsel %vm635_vm1, %v1166_v38, 0.0 }
 0x652   : > { %1171 = vadd.xlane.f32.xlu0 %v1170_v30 }
 0x6bd   : > { %v1169_v2 = vpop.xlane.xlu1 %1168 }
 0x6be   : > { %v1173_v39 = vmul.f32 %v1169_v2, %v2488_v20 }
 0x6c0   : > { %v1175_v41 = vadd.f32 1e-06, %v1173_v39 }
 0x6c2   : > { %1935 = vrsqrt.f32 %v1175_v41  ;;  %vm1183_vm14 = vweird.f32 %v1175_v41 }
 0x6c5   : > { %v1172_v42 = vpop.xlane.xlu0 %1171 }
 0x6c6   : > { %v1174_v4 = vmul.f32 %v1172_v42, %v2488_v20 }
 0x6c8   : > { %v1936_v43 = vpop.eup %1935  ;;  %v1176_v44 = vadd.f32 1e-06, %v1174_v4 }
 0x6c9   : > { %v1178_v45 = vmul.f32 %v1936_v43, %v1175_v41  ;;  %vm1184_vm13 = vweird.f32 %v1936_v43 }
 0x6ca   : > { %1937 = vrsqrt.f32 %v1176_v44  ;;  %vm1185_vm15 = vmor %vm1183_vm14, %vm1184_vm13  ;;  %vm1193_vm2 = vweird.f32 %v1176_v44 }
 0x6cb   : > { %v1179_v46 = vmul.f32 %v1936_v43, %v1178_v45 }
 0x6cd   : > { %v1180_v47 = vmul.f32 0.5, %v1179_v46 }
 0x6cf   : > { %v1181_v48 = vsub.f32 1.5, %v1180_v47 }
 0x6d0   : > { %v1938_v49 = vpop.eup %1937 }
 0x6d1   : > { %v1188_v50 = vmul.f32 %v1938_v49, %v1176_v44  ;;  %v1182_v51 = vmul.f32 %v1936_v43, %v1181_v48  ;;  %vm1194_vm0 = vweird.f32 %v1938_v49 }
 0x6d2   : > { %vm1195_vm3 = vmor %vm1193_vm2, %vm1194_vm0 }
 0x6d3   : > { %v1189_v52 = vmul.f32 %v1938_v49, %v1188_v50  ;;  %v1186_v54 = vsel %vm1185_vm15, %v1936_v43, %v1182_v51 }
 0x6d4   : > { %v1197_v56 = vmul.f32 %v1186_v54, %v2607_v32 }
 0x6d5   : > { %v1190_v53 = vmul.f32 0.5, %v1189_v52 }
 0x6d6   : > { %v1202_v59 = vmul.f32 %v1896_v0, %v1197_v56 }
 0x6d7   : > { %v1191_v55 = vsub.f32 1.5, %v1190_v53 }
 0x6d9   : > { %v1192_v61 = vmul.f32 %v1938_v49, %v1191_v55 }
 0x6db   : > { %v1196_v57 = vsel %vm1195_vm3, %v1938_v49, %v1192_v61 }
 0x6dc   : > { %v1198_v58 = vmul.f32 %v1196_v57, %v2613_v37 }
 0x6de   : > { %v1203_v60 = vmul.f32 %v1896_v0, %v1198_v58 }
 0x6e0   : > { %v1204_v62 = vpack.c.bf16 %v1203_v60, %v1202_v59 }
 0x6e2   : > { %1669 = vmatmul.msk.bf16.vlgmr.msra.gmra.mxu1 %vm635_vm1, %v1204_v62 }
 0x75f   : > { %v1233_v63 = vpop.f32.mrf.mxu1 }
 0x760   : > { %1278 = vrot.lane.b32.xlu2 %v1233_v63, %s2232_s7  ;;  %v1238_v5 = vsub.f32 0.0, %v1233_v63 }
 0x762   : > { %v1240_v7 = vmul.f32 1.442695, %v1238_v5 }
 0x764   : > { %1939 = vpow2.f32 %v1240_v7 }
 0x767   : > { %v1235_v3 = vpop.f32.mrf.mxu1 }
 0x768   : > { %1280 = vrot.lane.b32.xlu2 %v1235_v3, %s2232_s7  ;;  %v1239_v6 = vsub.f32 0.0, %v1235_v3 }
 0x76a   : > { %v1242_v8 = vmul.f32 1.442695, %v1239_v6  ;;  %v1940_v9 = vpop.eup %1939 }
 0x76b   : > { %v1244_v12 = vadd.f32 1.0, %v1940_v9 }
 0x76c   : > { %1941 = vpow2.f32 %v1242_v8 }
 0x76d   : > { %1943 = vrcp.f32 %v1244_v12  ;;  %vm1251_vm6 = vweird.f32 %v1244_v12  ;;  %v1257_v26 = vand.u32 2147483648, %v1244_v12  ;;  %v1255_v31 = vand.u32 2147483647, %v1244_v12 }
 0x76f   : > { %v1258_v30 = vor.u32 1.1754944e-38, %v1257_v26  ;;  %vm1256_vm12 = vcmp.eq.f32.partialorder %v1255_v31, 8.507059e+37 }
 0x772   : > { %v1942_v10 = vpop.eup %1941 }
 0x773   : > { %v1245_v14 = vadd.f32 1.0, %v1942_v10  ;;  %v1944_v16 = vpop.eup %1943 }
 0x774   : > { %v1247_v19 = vmul.f32 %v1944_v16, %v1244_v12  ;;  %vm1252_vm4 = vweird.f32 %v1944_v16 }
 0x775   : > { %1945 = vrcp.f32 %v1245_v14  ;;  %v1271_v28 = vand.u32 2147483648, %v1245_v14  ;;  %vm1265_vm7 = vweird.f32 %v1245_v14  ;;  %v1269_v29 = vand.u32 2147483647, %v1245_v14  ;;  %vm1253_vm8 = vmor %vm1251_vm6, %vm1252_vm4 }
 0x776   : > { %v1248_v23 = vsub.f32 1.0, %v1247_v19 }
 0x777   : > { %v1272_v38 = vor.u32 1.1754944e-38, %v1271_v28  ;;  %vm1270_vm11 = vcmp.eq.f32.partialorder %v1269_v29, 8.507059e+37 }
 0x778   : > { %v1249_v25 = vmul.f32 %v1944_v16, %v1248_v23 }
 0x77a   : > { %v1250_v21 = vadd.f32 %v1944_v16, %v1249_v25 }
 0x77b   : > { %v1946_v17 = vpop.eup %1945 }
 0x77c   : > { %v1261_v18 = vmul.f32 %v1946_v17, %v1245_v14  ;;  %vm1266_vm5 = vweird.f32 %v1946_v17  ;;  %v1254_v35 = vsel %vm1253_vm8, %v1944_v16, %v1250_v21 }
 0x77d   : > { %vm1267_vm9 = vmor %vm1265_vm7, %vm1266_vm5  ;;  %v1259_v2 = vsel %vm1256_vm12, %v1258_v30, %v1254_v35 }
 0x77e   : > { %v1262_v22 = vsub.f32 1.0, %v1261_v18  ;;  %v1274_v40 = vmul.f32 %v1259_v2, %v1233_v63 }
 0x780   : > { %v1263_v24 = vmul.f32 %v1946_v17, %v1262_v22 }
 0x782   : > { %v1264_v27 = vadd.f32 %v1946_v17, %v1263_v24 }
 0x784   : > { %v1268_v34 = vsel %vm1267_vm9, %v1946_v17, %v1264_v27 }
 0x785   : > { %v1273_v36 = vsel %vm1270_vm11, %v1272_v38, %v1268_v34 }
 0x786   : > { %v1275_v39 = vmul.f32 %v1273_v36, %v1235_v3 }
 0x7ba   : > { %v1279_v33 = vpop.permute.xlu2 %1278 }
 0x7bb   : > { %v1284_v42 = vmul.f32 %v1279_v33, %v1274_v40 }
 0x7c2   : > { %v1281_v41 = vpop.permute.xlu2 %1280 }
 0x7c3   : > { %v1285_v4 = vmul.f32 %v1281_v41, %v1275_v39 }
 0x7c5   : > { %v1286_v43 = vpack.c.bf16 %v1285_v4, %v1284_v42 }
 0x7c7   : > { %1686 = vmatmul.msk.bf16.vlgmr.msra.gmra.mxu0 %vm946_vm10, %v1286_v43 }
 0x844   : > { %v1331_v44 = vpop.f32.mrf.mxu0 }
 0x845   : > { %v1336_v45 = vadd.f32 %v1331_v44, %v2607_v32 }
 0x847   : > { %1338 = vst.msk [vmem:[#allocation2] sm:$0xff] %vm635_vm1, %v1336_v45 }
 0x84b   : > { %1343 = sbr.rel (%p1687_p1) target bundleno = 2541 (0x9ed), region = 104 }
 0x84c   : > { %v1333_v46 = vpop.f32.mrf.mxu0 }
 0x84d   : > { %v1337_v47 = vadd.f32 %v1333_v46, %v2613_v37 }
 0x84f   : > { %1339 = vst.msk [vmem:[#allocation2 + $0x8] sm:$0xff] %vm635_vm1, %v1337_v47 }
 0x850   : > { %v1344_v48 = vsel %vm635_vm1, %v1336_v45, 0.0  ;;  %v1347_v49 = vsel %vm635_vm1, %v1337_v47, 0.0  ;;  %v1718_v56 = vld [vmem:[#allocation12 + $0x8] sm:$0xff]  ;;  %v1717_v58 = vld [vmem:[#allocation12] sm:$0xff] }
 0x851   : > { %1345 = vadd.xlane.f32.xlu0 %v1344_v48  ;;  %1426 = vmatpush.bf16.msra.mxu0 %v1718_v56  ;;  %v1948_v23 = vld [vmem:[%s2711_s14] ss:$0 sm:$0xff] }
 0x855   : > { %1427 = vmatpush.bf16.msra.mxu0 %v1717_v58 }
 0x859   : > { %1348 = vadd.xlane.f32.xlu0 %v1347_v49 }
 0x8c4   : > { %v1346_v50 = vpop.xlane.xlu0 %1345 }
 0x8c5   : > { %v1350_v51 = vmul.f32 %v1346_v50, %v2488_v20 }
 0x8c7   : > { %v1352_v32 = vsub.f32 %v1336_v45, %v1350_v51 }
 0x8c9   : > { %v1354_v52 = vmul.f32 %v1352_v32, %v1352_v32 }
 0x8cb   : > { %v1356_v53 = vsel %vm635_vm1, %v1354_v52, 0.0 }
 0x8cc   : > { %1357 = vadd.xlane.f32.xlu1 %v1356_v53  ;;  %v1349_v37 = vpop.xlane.xlu0 %1348 }
 0x8cd   : > { %v1351_v54 = vmul.f32 %v1349_v37, %v2488_v20 }
 0x8cf   : > { %v1353_v55 = vsub.f32 %v1337_v47, %v1351_v54 }
 0x8d1   : > { %v1355_v61 = vmul.f32 %v1353_v55, %v1353_v55 }
 0x8d3   : > { %v1359_v0 = vsel %vm635_vm1, %v1355_v61, 0.0 }
 0x8d4   : > { %1360 = vadd.xlane.f32.xlu1 %v1359_v0 }
 0x93f   : > { %v1358_v57 = vpop.xlane.xlu1 %1357 }
 0x940   : > { %v1362_v59 = vmul.f32 %v1358_v57, %v2488_v20 }
 0x942   : > { %v1364_v60 = vadd.f32 1e-06, %v1362_v59 }
 0x944   : > { %1949 = vrsqrt.f32 %v1364_v60  ;;  %vm1372_vm13 = vweird.f32 %v1364_v60 }
 0x947   : > { %v1361_v62 = vpop.xlane.xlu1 %1360 }
 0x948   : > { %v1363_v63 = vmul.f32 %v1361_v62, %v2488_v20  ;;  %v1947_v20 = vld [vmem:[%s2710_s15] ss:$0 sm:$0xff] }
 0x94a   : > { %v1950_v1 = vpop.eup %1949  ;;  %v1365_v3 = vadd.f32 1e-06, %v1363_v63 }
 0x94b   : > { %v1367_v5 = vmul.f32 %v1950_v1, %v1364_v60  ;;  %vm1373_vm10 = vweird.f32 %v1950_v1 }
 0x94c   : > { %1951 = vrsqrt.f32 %v1365_v3  ;;  %vm1374_vm14 = vmor %vm1372_vm13, %vm1373_vm10  ;;  %vm1382_vm0 = vweird.f32 %v1365_v3 }
 0x94d   : > { %v1368_v6 = vmul.f32 %v1950_v1, %v1367_v5 }
 0x94f   : > { %v1369_v7 = vmul.f32 0.5, %v1368_v6 }
 0x951   : > { %v1370_v8 = vsub.f32 1.5, %v1369_v7 }
 0x952   : > { %v1952_v9 = vpop.eup %1951 }
 0x953   : > { %v1371_v10 = vmul.f32 %v1950_v1, %v1370_v8  ;;  %v1377_v11 = vmul.f32 %v1952_v9, %v1365_v3  ;;  %vm1383_vm15 = vweird.f32 %v1952_v9 }
 0x954   : > { %vm1384_vm2 = vmor %vm1382_vm0, %vm1383_vm15 }
 0x955   : > { %v1378_v12 = vmul.f32 %v1952_v9, %v1377_v11  ;;  %v1375_v14 = vsel %vm1374_vm14, %v1950_v1, %v1371_v10 }
 0x956   : > { %v1386_v16 = vmul.f32 %v1375_v14, %v1352_v32 }
 0x957   : > { %v1379_v13 = vmul.f32 0.5, %v1378_v12 }
 0x958   : > { %v1392_v22 = vmul.f32 %v1947_v20, %v1386_v16 }
 0x959   : > { %v1380_v15 = vsub.f32 1.5, %v1379_v13 }
 0x95a   : > { %v1398_v25 = vadd.f32 %v1948_v23, %v1392_v22 }
 0x95b   : > { %v1381_v17 = vmul.f32 %v1952_v9, %v1380_v15 }
 0x95d   : > { %v1385_v18 = vsel %vm1384_vm2, %v1952_v9, %v1381_v17 }
 0x95e   : > { %v1387_v19 = vmul.f32 %v1385_v18, %v1353_v55 }
 0x960   : > { %v1393_v24 = vmul.f32 %v1947_v20, %v1387_v19 }
 0x962   : > { %v1399_v27 = vadd.f32 %v1948_v23, %v1393_v24 }
 0x964   : > { %v1400_v21 = vpack.c.bf16 %v1399_v27, %v1398_v25 }
 0x966   : > { %1696 = vmatmul.msk.bf16.vlgmr.msra.gmra.mxu0 %vm635_vm1, %v1400_v21 }
 0x9e3   : > { %v1429_v28 = vpop.f32.mrf.mxu0 }
 0x9e4   : > { %1434 = vst [vmem:[#allocation14] sm:$0xff] %v1429_v28 }
 0x9eb   : > { %v1431_v26 = vpop.f32.mrf.mxu0 }
 0x9ec   : > { %1435 = vst [vmem:[#allocation14 + $0x8] sm:$0xff] %v1431_v26 }
 0x9ed PF: > { %p1780_p4 = scmp.eq.s32.totalorder %s2327_s29, 1  ;;  %s2236_s11 = smov [#allocation14]  }
 0x9ee   : > { %s1441_s21 = sshll.u32 %s2236_s11, 4  ;;  %s2712_s7 = sld [smem:[#allocation26_spill]]  ;;  %s1442_s21 = int_to_ptr.vmem [resolvable:$true] %s1441_s21 }
 0x9ef   : > { %s2237_s10 = smov 128  }
 0x9f4   : > { %s1443_s25 = sshll.u32 %s2712_s7, 4  ;;  %s1444_s25 = int_to_ptr.hbm [resolvable:$true] %s1443_s25 }
 0x9f5   : > { %1746 = dma.vmem_to_hbm [thread:$0]  (%p1780_p4), %s1442_s21, 256, %s1444_s25, [#allocation5], %s2237_s10, %s2237_s10, %s2233_s17  }
 0x9f6   : > { %2198 = dma.done.wait (%p1780_p4), [#allocation5], 256  }
 0x9f7   : > { %2200 = vsyncadd (%p1780_p4), [#allocation5], 4294967040 }
 0x9f8 PF: > { %p27_p6 = scmp.ge.s32.totalorder %s2381_s16, 4   ;;  %s2713_s25 = smov %s2207_s26 }
 0x9f9   : > { %s2714_s26 = smov %s2211_s27  ;;  %s2715_s27 = smov %s2390_s24 }
 0x9fa   : > { %s2716_s28 = smov %s2381_s16  ;;  %29 = sbr.rel (!%p27_p6) target bundleno = 14 (0xe), region = 153 }
 0x9ff   :  { %1460 = vsyncpa [#allocation4], 1 }
 0xa00   :  { %1462 = vsyncpa [#allocation4 + $0x1], 1 }
 0xa01   :  { %1463 = vsyncpa [#allocation7], 1 }
 0xa02   :  { %1465 = vsyncpa [#allocation7 + $0x1], 1 }
 0xa03   :  { %1466 = vsyncpa [#allocation10], 1 }
 0xa04   :  { %1467 = vsyncpa [#allocation13], 1 }
 0xa05   :  { %1468 = vsyncpa [#allocation5], 1 }
 0xa06   :  { %1470 = vsyncpa [#allocation5 + $0x1], 1 }

</bundles_post_ra>
